<compile_context>
chip_gen: v5e
topology: v5e:2x2
jax: 0.10.0
libtpu: 0.0.40
codegen_flags: <defaults>
</compile_context>

<pallas_src>
import jax
import jax.numpy as jnp
from jax.experimental import pallas as pl
from jax.experimental.pallas import tpu as pltpu

# Small, module-consistent sizes (original: dw=600, dh=100, max_len=10,
# n_vocab = len(words)+2, PAD = len(words)+1).
B       = 4      # batch
MAX_LEN = 8      # sequence length == MaxPool1d kernel size
DW      = 128    # embedding dim / conv in_channels
DH      = 32     # conv out_channels
NCLS    = 4      # linear output classes
N_VOCAB = 50
PAD_IDX = N_VOCAB - 1   # == len(words)+1

LANE = 128              # lane-dense output slab width
NEG  = jnp.float32(-1e30)   # "minus infinity" for padded logit lanes (NOT -inf)

# The in-kernel roll-based max-pool fold assumes these layout properties
# (true for the small sizes chosen here).
assert (MAX_LEN * DH) % LANE == 0 and ((MAX_LEN * DH) & (MAX_LEN * DH - 1)) == 0
assert LANE % DH == 0 and (DH & (DH - 1)) == 0


def cnn_kernel(tok_ref, emb_ref, wbig_ref, bc_ref, wl_ref, bl_ref, out_ref, e_ref):
    # tok_ref : (B*L,)   int32, SMEM (scalar-prefetch operand)
    # emb_ref : (V,1,DW) f32    embedding table (row index on a major dim)
    # wbig_ref: (L*DW, L*DH) bf16  conv-as-one-matmul weights (cols = t*DH + o)
    # bc_ref  : (1, L*DH) f32   conv bias tiled over t
    # wl_ref  : (128,128) f32   classifier; rows >= DH and cols >= NCLS are 0
    # bl_ref  : (1, 128)  f32   classifier bias; lanes >= NCLS hold -1e30
    # out_ref : (B, 128)  f32   lane-dense softmax slab (classes in lanes [0,NCLS))
    # e_ref   : (B, L*DW) f32   scratch: flattened embeddings (the torch .view
    #                           reinterpretation is folded into wbig)

    # 1) Fused embedding gather: B*L dynamic row reads, lane-aligned stores.
    for b in range(B):
        for t in range(MAX_LEN):
            row = tok_ref[b * MAX_LEN + t]
            e_ref[pl.ds(b, 1), pl.ds(t * DW, DW)] = emb_ref[row]

    # 2) Conv1d(k=3, padding=1) + bias: ONE bf16 MXU pass (K=L*DW, N=L*DH).
    e_bf = e_ref[...].astype(jnp.bfloat16)
    conv = jnp.dot(e_bf, wbig_ref[...],
                   preferred_element_type=jnp.float32) + bc_ref[...]
    conv = jnp.maximum(conv, 0.0)                        # ReLU, (B, L*DH)

    # 3) MaxPool1d over the full sequence.  Columns are t-major (col = t*DH+o).
    #    Fold with vreg-aligned half slices down to 128 lanes, then XLU rolls
    #    (the {o, o+DH, ...} lane groups are closed under the rolls, so the
    #    roll direction is irrelevant).  Lanes [0, DH) end up holding the true
    #    pooled max; the other lanes are harmless extra maxima.
    w = conv.shape[1]
    while w > LANE:
        w //= 2
        conv = jnp.maximum(conv[:, :w], conv[:, w:])     # 128-aligned slice fold
    shift = LANE // 2
    while shift >= DH:
        conv = jnp.maximum(conv, pltpu.roll(conv, shift, axis=1))
        shift //= 2

    # 4) Linear + softmax over the lane-dense 128-wide slab.  wl rows >= DH are
    #    zero so the garbage lanes of `conv` do not contribute; bl lanes
    #    >= NCLS are -1e30 so exp() zeroes them out of the softmax (f32-safe).
    logits = jnp.dot(conv, wl_ref[...],
                     preferred_element_type=jnp.float32) + bl_ref[...]
    m = jnp.max(logits, axis=1, keepdims=True)
    ex = jnp.exp(logits - m)
    s = jnp.sum(ex, axis=1, keepdims=True)
    out_ref[...] = ex * pl.reciprocal(s, approx=True)    # EUP reciprocal


def prepare_params(emb_w, conv_w, conv_b, lin_w, lin_b):
    """One-time (model-load) weight re-layout from torch layouts.

    Folds the `.view(B, dw, L)` memory reinterpretation and the 3-tap conv
    (padding=1) into a single matmul weight W_big (stored bf16), tiles the conv
    bias over t, and pads the classifier to a 128x128 slab.  Pure function of
    the constant parameters — none of it runs per call.
    """
    L, dw, dh = MAX_LEN, DW, DH
    # torch padding_idx semantics: the PAD row is zero-initialized; forward
    # math only reads the table, so just sanity-check it at load time (eager).
    assert bool(jnp.all(emb_w[PAD_IDX] == 0.0)), "PAD embedding row must be zero"

    # conv[b, o, t] = sum_{c,k valid} e_flat[b, c*L + t+k-1] * conv_w[o, c, k]
    # where e_flat[b] = emb(tokens[b]).flatten()  (this IS the torch .view).
    w_big = jnp.zeros((L * dw, L * dh), jnp.float32)
    for k in range(3):
        wk = conv_w[:, :, k].T.astype(jnp.float32)          # (dw, dh): [c, o]
        for t in range(L):
            tt = t + k - 1
            if 0 <= tt < L:                                  # padding=1 bounds
                # rows j = c*L + tt (c = 0..dw-1), cols t*dh + o
                w_big = w_big.at[tt::L, t * dh:(t + 1) * dh].add(wk)
    b_full = jnp.tile(conv_b.astype(jnp.float32), L).reshape(1, L * dh)

    # Classifier padded to (128,128): rows >= dh and cols >= NCLS zero.
    # Bias lanes >= NCLS at -1e30 (NOT -inf: keeps the max/exp path NaN-free).
    wl_pad = jnp.zeros((LANE, LANE), jnp.float32)
    wl_pad = wl_pad.at[:dh, :NCLS].set(lin_w.T.astype(jnp.float32))
    bl_pad = jnp.full((1, LANE), NEG, jnp.float32)
    bl_pad = bl_pad.at[0, :NCLS].set(lin_b.astype(jnp.float32))

    return dict(
        emb=emb_w.astype(jnp.float32).reshape(N_VOCAB, 1, DW),  # major-dim row index
        w_big=w_big.astype(jnp.bfloat16),                       # halves dominant DMA
        b_full=b_full, wl_pad=wl_pad, bl_pad=bl_pad)


@jax.jit
def cnn_forward(params, tokens):
    """tokens: (B, L) int; params: output of prepare_params.  Returns (B, NCLS)."""
    bsz, seq = tokens.shape
    tok_flat = tokens.reshape(-1).astype(jnp.int32)       # -> SMEM via scalar prefetch

    cost = pl.CostEstimate(
        flops=2 * bsz * (seq * DW) * (seq * DH) + 2 * bsz * LANE * LANE,
        transcendentals=bsz * (LANE + 1),
        bytes_accessed=(tok_flat.size * 4 + params["emb"].size * 4
                        + params["w_big"].size * 2 + params["b_full"].size * 4
                        + params["wl_pad"].size * 4 + params["bl_pad"].size * 4
                        + bsz * LANE * 4),
    )

    out_pad = pl.pallas_call(
        cnn_kernel,
        out_shape=jax.ShapeDtypeStruct((bsz, LANE), jnp.float32),
        grid_spec=pltpu.PrefetchScalarGridSpec(
            num_scalar_prefetch=1,                        # tokens -> SMEM
            grid=(1,),                                    # single fused step at B=4
            in_specs=[pl.BlockSpec(memory_space=pltpu.MemorySpace.VMEM)] * 5,
            out_specs=pl.BlockSpec(memory_space=pltpu.MemorySpace.VMEM),
            scratch_shapes=[pltpu.VMEM((bsz, seq * DW), jnp.float32)],
        ),
        compiler_params=pltpu.CompilerParams(dimension_semantics=("arbitrary",)),
        cost_estimate=cost,
    )(tok_flat, params["emb"], params["w_big"], params["b_full"],
      params["wl_pad"], params["bl_pad"])

    # TODO(synk): downstream consumers could take the lane-dense (B,128) slab
    # directly and avoid this tiny slice; the module's public output is (B,4).
    return out_pad[:, :NCLS]


def _reference(tokens, emb_w, conv_w, conv_b, lin_w, lin_b):
    # Pure-JAX f32 reference with the same (torch) semantics, for sanity check.
    e = emb_w[tokens].astype(jnp.float32)                    # (B, L, DW)
    x = e.reshape(tokens.shape[0], DW, MAX_LEN)              # torch .view
    xpad = jnp.pad(x, ((0, 0), (0, 0), (1, 1)))
    conv = jnp.zeros((tokens.shape[0], DH, MAX_LEN), jnp.float32)
    for k in range(3):
        conv = conv + jnp.einsum('bct,oc->bot',
                                 xpad[:, :, k:k + MAX_LEN], conv_w[:, :, k])
    conv = jnp.maximum(conv + conv_b[None, :, None], 0.0)
    pooled = jnp.max(conv, axis=2)
    logits = pooled @ lin_w.T + lin_b
    return jax.nn.softmax(logits, axis=1)


if __name__ == "__main__":
    key = jax.random.PRNGKey(0)
    k1, k2, k3, k4, k5, k6 = jax.random.split(key, 6)

    emb_w = 0.1 * jax.random.normal(k1, (N_VOCAB, DW), jnp.float32)
    emb_w = emb_w.at[PAD_IDX].set(0.0)          # padding_idx row is all zeros
    conv_w = 0.1 * jax.random.normal(k2, (DH, DW, 3), jnp.float32)
    conv_b = 0.1 * jax.random.normal(k3, (DH,), jnp.float32)
    lin_w = 0.1 * jax.random.normal(k4, (NCLS, DH), jnp.float32)
    lin_b = 0.1 * jax.random.normal(k5, (NCLS,), jnp.float32)

    tokens = jax.random.randint(k6, (B, MAX_LEN), 0, N_VOCAB, dtype=jnp.int32)
    tokens = tokens.at[:, -2:].set(PAD_IDX)     # tail padding tokens

    params = prepare_params(emb_w, conv_w, conv_b, lin_w, lin_b)  # load-time
    out = jax.block_until_ready(cnn_forward(params, tokens))
    ref = jax.block_until_ready(
        _reference(tokens, emb_w, conv_w, conv_b, lin_w, lin_b))

    assert out.shape == (B, NCLS), out.shape
    # Tolerance covers the bf16 conv weights/activations (f32 MXU accumulate)
    # and the EUP approx reciprocal in the softmax.
    assert jnp.allclose(out, ref, atol=5e-3, rtol=5e-3), \
        float(jnp.max(jnp.abs(out - ref)))
    print("KERNEL_OK")
</pallas_src>

<mosaic_0001>
module attributes {stable_mosaic.version = 11 : i64} {
  func.func @cnn_kernel(%arg0: i32, %arg1: memref<32xi32, #tpu.memory_space<smem>>, %arg2: memref<50x1x128xf32, #tpu.memory_space<vmem>>, %arg3: memref<1024x256xbf16, #tpu.memory_space<vmem>>, %arg4: memref<1x256xf32, #tpu.memory_space<vmem>>, %arg5: memref<128x128xf32, #tpu.memory_space<vmem>>, %arg6: memref<1x128xf32, #tpu.memory_space<vmem>>, %arg7: memref<4x128xf32, #tpu.memory_space<vmem>>, %arg8: memref<4x1024xf32, #tpu.memory_space<vmem>>) attributes {dimension_semantics = [#tpu.dimension_semantics<arbitrary>], iteration_bounds = array<i64: 1>, scalar_prefetch = 1 : i64, scratch_operands = 1 : i64, tpu.core_type = #tpu.core_type<tc>, window_params = [{pipeline_mode = #tpu.pipeline_mode<synchronous>, transform_indices = @transform_0, window_bounds = array<i64: 50, 1, 128>}, {pipeline_mode = #tpu.pipeline_mode<synchronous>, transform_indices = @transform_1, window_bounds = array<i64: 1024, 256>}, {pipeline_mode = #tpu.pipeline_mode<synchronous>, transform_indices = @transform_2, window_bounds = array<i64: 1, 256>}, {pipeline_mode = #tpu.pipeline_mode<synchronous>, transform_indices = @transform_3, window_bounds = array<i64: 128, 128>}, {pipeline_mode = #tpu.pipeline_mode<synchronous>, transform_indices = @transform_4, window_bounds = array<i64: 1, 128>}, {pipeline_mode = #tpu.pipeline_mode<synchronous>, transform_indices = @transform_5, window_bounds = array<i64: 4, 128>}]} {
    %c0 = arith.constant 0 : index
    %0 = memref.load %arg1[%c0] : memref<32xi32, #tpu.memory_space<smem>>
    %1 = arith.index_cast %0 : i32 to index
    %c0_0 = arith.constant 0 : index
    %c0_1 = arith.constant 0 : index
    %2 = vector.load %arg2[%1, %c0_0, %c0_1] : memref<50x1x128xf32, #tpu.memory_space<vmem>>, vector<1x1x128xf32>
    %3 = vector.shape_cast %2 : vector<1x1x128xf32> to vector<1x128xf32>
    %c0_2 = arith.constant 0 : index
    %c0_3 = arith.constant 0 : index
    %4 = vector.load %arg8[%c0_2, %c0_3] : memref<4x1024xf32, #tpu.memory_space<vmem>>, vector<1x128xf32>
    tpu.vector_store %arg8[%c0_2, %c0_3], %3 {strides = array<i32>} : memref<4x1024xf32, #tpu.memory_space<vmem>>, vector<1x128xf32>,
    %c1 = arith.constant 1 : index
    %5 = memref.load %arg1[%c1] : memref<32xi32, #tpu.memory_space<smem>>
    %6 = arith.index_cast %5 : i32 to index
    %c0_4 = arith.constant 0 : index
    %c0_5 = arith.constant 0 : index
    %7 = vector.load %arg2[%6, %c0_4, %c0_5] : memref<50x1x128xf32, #tpu.memory_space<vmem>>, vector<1x1x128xf32>
    %8 = vector.shape_cast %7 : vector<1x1x128xf32> to vector<1x128xf32>
    %c0_6 = arith.constant 0 : index
    %c128 = arith.constant 128 : index
    %9 = vector.load %arg8[%c0_6, %c128] : memref<4x1024xf32, #tpu.memory_space<vmem>>, vector<1x128xf32>
    tpu.vector_store %arg8[%c0_6, %c128], %8 {strides = array<i32>} : memref<4x1024xf32, #tpu.memory_space<vmem>>, vector<1x128xf32>,
    %c2 = arith.constant 2 : index
    %10 = memref.load %arg1[%c2] : memref<32xi32, #tpu.memory_space<smem>>
    %11 = arith.index_cast %10 : i32 to index
    %c0_7 = arith.constant 0 : index
    %c0_8 = arith.constant 0 : index
    %12 = vector.load %arg2[%11, %c0_7, %c0_8] : memref<50x1x128xf32, #tpu.memory_space<vmem>>, vector<1x1x128xf32>
    %13 = vector.shape_cast %12 : vector<1x1x128xf32> to vector<1x128xf32>
    %c0_9 = arith.constant 0 : index
    %c256 = arith.constant 256 : index
    %14 = vector.load %arg8[%c0_9, %c256] : memref<4x1024xf32, #tpu.memory_space<vmem>>, vector<1x128xf32>
    tpu.vector_store %arg8[%c0_9, %c256], %13 {strides = array<i32>} : memref<4x1024xf32, #tpu.memory_space<vmem>>, vector<1x128xf32>,
    %c3 = arith.constant 3 : index
    %15 = memref.load %arg1[%c3] : memref<32xi32, #tpu.memory_space<smem>>
    %16 = arith.index_cast %15 : i32 to index
    %c0_10 = arith.constant 0 : index
    %c0_11 = arith.constant 0 : index
    %17 = vector.load %arg2[%16, %c0_10, %c0_11] : memref<50x1x128xf32, #tpu.memory_space<vmem>>, vector<1x1x128xf32>
    %18 = vector.shape_cast %17 : vector<1x1x128xf32> to vector<1x128xf32>
    %c0_12 = arith.constant 0 : index
    %c384 = arith.constant 384 : index
    %19 = vector.load %arg8[%c0_12, %c384] : memref<4x1024xf32, #tpu.memory_space<vmem>>, vector<1x128xf32>
    tpu.vector_store %arg8[%c0_12, %c384], %18 {strides = array<i32>} : memref<4x1024xf32, #tpu.memory_space<vmem>>, vector<1x128xf32>,
    %c4 = arith.constant 4 : index
    %20 = memref.load %arg1[%c4] : memref<32xi32, #tpu.memory_space<smem>>
    %21 = arith.index_cast %20 : i32 to index
    %c0_13 = arith.constant 0 : index
    %c0_14 = arith.constant 0 : index
    %22 = vector.load %arg2[%21, %c0_13, %c0_14] : memref<50x1x128xf32, #tpu.memory_space<vmem>>, vector<1x1x128xf32>
    %23 = vector.shape_cast %22 : vector<1x1x128xf32> to vector<1x128xf32>
    %c0_15 = arith.constant 0 : index
    %c512 = arith.constant 512 : index
    %24 = vector.load %arg8[%c0_15, %c512] : memref<4x1024xf32, #tpu.memory_space<vmem>>, vector<1x128xf32>
    tpu.vector_store %arg8[%c0_15, %c512], %23 {strides = array<i32>} : memref<4x1024xf32, #tpu.memory_space<vmem>>, vector<1x128xf32>,
    %c5 = arith.constant 5 : index
    %25 = memref.load %arg1[%c5] : memref<32xi32, #tpu.memory_space<smem>>
    %26 = arith.index_cast %25 : i32 to index
    %c0_16 = arith.constant 0 : index
    %c0_17 = arith.constant 0 : index
    %27 = vector.load %arg2[%26, %c0_16, %c0_17] : memref<50x1x128xf32, #tpu.memory_space<vmem>>, vector<1x1x128xf32>
    %28 = vector.shape_cast %27 : vector<1x1x128xf32> to vector<1x128xf32>
    %c0_18 = arith.constant 0 : index
    %c640 = arith.constant 640 : index
    %29 = vector.load %arg8[%c0_18, %c640] : memref<4x1024xf32, #tpu.memory_space<vmem>>, vector<1x128xf32>
    tpu.vector_store %arg8[%c0_18, %c640], %28 {strides = array<i32>} : memref<4x1024xf32, #tpu.memory_space<vmem>>, vector<1x128xf32>,
    %c6 = arith.constant 6 : index
    %30 = memref.load %arg1[%c6] : memref<32xi32, #tpu.memory_space<smem>>
    %31 = arith.index_cast %30 : i32 to index
    %c0_19 = arith.constant 0 : index
    %c0_20 = arith.constant 0 : index
    %32 = vector.load %arg2[%31, %c0_19, %c0_20] : memref<50x1x128xf32, #tpu.memory_space<vmem>>, vector<1x1x128xf32>
    %33 = vector.shape_cast %32 : vector<1x1x128xf32> to vector<1x128xf32>
    %c0_21 = arith.constant 0 : index
    %c768 = arith.constant 768 : index
    %34 = vector.load %arg8[%c0_21, %c768] : memref<4x1024xf32, #tpu.memory_space<vmem>>, vector<1x128xf32>
    tpu.vector_store %arg8[%c0_21, %c768], %33 {strides = array<i32>} : memref<4x1024xf32, #tpu.memory_space<vmem>>, vector<1x128xf32>,
    %c7 = arith.constant 7 : index
    %35 = memref.load %arg1[%c7] : memref<32xi32, #tpu.memory_space<smem>>
    %36 = arith.index_cast %35 : i32 to index
    %c0_22 = arith.constant 0 : index
    %c0_23 = arith.constant 0 : index
    %37 = vector.load %arg2[%36, %c0_22, %c0_23] : memref<50x1x128xf32, #tpu.memory_space<vmem>>, vector<1x1x128xf32>
    %38 = vector.shape_cast %37 : vector<1x1x128xf32> to vector<1x128xf32>
    %c0_24 = arith.constant 0 : index
    %c896 = arith.constant 896 : index
    %39 = vector.load %arg8[%c0_24, %c896] : memref<4x1024xf32, #tpu.memory_space<vmem>>, vector<1x128xf32>
    tpu.vector_store %arg8[%c0_24, %c896], %38 {strides = array<i32>} : memref<4x1024xf32, #tpu.memory_space<vmem>>, vector<1x128xf32>,
    %c8 = arith.constant 8 : index
    %40 = memref.load %arg1[%c8] : memref<32xi32, #tpu.memory_space<smem>>
    %41 = arith.index_cast %40 : i32 to index
    %c0_25 = arith.constant 0 : index
    %c0_26 = arith.constant 0 : index
    %42 = vector.load %arg2[%41, %c0_25, %c0_26] : memref<50x1x128xf32, #tpu.memory_space<vmem>>, vector<1x1x128xf32>
    %43 = vector.shape_cast %42 : vector<1x1x128xf32> to vector<1x128xf32>
    %c1_27 = arith.constant 1 : index
    %c0_28 = arith.constant 0 : index
    %44 = vector.load %arg8[%c1_27, %c0_28] : memref<4x1024xf32, #tpu.memory_space<vmem>>, vector<1x128xf32>
    tpu.vector_store %arg8[%c1_27, %c0_28], %43 {strides = array<i32>} : memref<4x1024xf32, #tpu.memory_space<vmem>>, vector<1x128xf32>,
    %c9 = arith.constant 9 : index
    %45 = memref.load %arg1[%c9] : memref<32xi32, #tpu.memory_space<smem>>
    %46 = arith.index_cast %45 : i32 to index
    %c0_29 = arith.constant 0 : index
    %c0_30 = arith.constant 0 : index
    %47 = vector.load %arg2[%46, %c0_29, %c0_30] : memref<50x1x128xf32, #tpu.memory_space<vmem>>, vector<1x1x128xf32>
    %48 = vector.shape_cast %47 : vector<1x1x128xf32> to vector<1x128xf32>
    %c1_31 = arith.constant 1 : index
    %c128_32 = arith.constant 128 : index
    %49 = vector.load %arg8[%c1_31, %c128_32] : memref<4x1024xf32, #tpu.memory_space<vmem>>, vector<1x128xf32>
    tpu.vector_store %arg8[%c1_31, %c128_32], %48 {strides = array<i32>} : memref<4x1024xf32, #tpu.memory_space<vmem>>, vector<1x128xf32>,
    %c10 = arith.constant 10 : index
    %50 = memref.load %arg1[%c10] : memref<32xi32, #tpu.memory_space<smem>>
    %51 = arith.index_cast %50 : i32 to index
    %c0_33 = arith.constant 0 : index
    %c0_34 = arith.constant 0 : index
    %52 = vector.load %arg2[%51, %c0_33, %c0_34] : memref<50x1x128xf32, #tpu.memory_space<vmem>>, vector<1x1x128xf32>
    %53 = vector.shape_cast %52 : vector<1x1x128xf32> to vector<1x128xf32>
    %c1_35 = arith.constant 1 : index
    %c256_36 = arith.constant 256 : index
    %54 = vector.load %arg8[%c1_35, %c256_36] : memref<4x1024xf32, #tpu.memory_space<vmem>>, vector<1x128xf32>
    tpu.vector_store %arg8[%c1_35, %c256_36], %53 {strides = array<i32>} : memref<4x1024xf32, #tpu.memory_space<vmem>>, vector<1x128xf32>,
    %c11 = arith.constant 11 : index
    %55 = memref.load %arg1[%c11] : memref<32xi32, #tpu.memory_space<smem>>
    %56 = arith.index_cast %55 : i32 to index
    %c0_37 = arith.constant 0 : index
    %c0_38 = arith.constant 0 : index
    %57 = vector.load %arg2[%56, %c0_37, %c0_38] : memref<50x1x128xf32, #tpu.memory_space<vmem>>, vector<1x1x128xf32>
    %58 = vector.shape_cast %57 : vector<1x1x128xf32> to vector<1x128xf32>
    %c1_39 = arith.constant 1 : index
    %c384_40 = arith.constant 384 : index
    %59 = vector.load %arg8[%c1_39, %c384_40] : memref<4x1024xf32, #tpu.memory_space<vmem>>, vector<1x128xf32>
    tpu.vector_store %arg8[%c1_39, %c384_40], %58 {strides = array<i32>} : memref<4x1024xf32, #tpu.memory_space<vmem>>, vector<1x128xf32>,
    %c12 = arith.constant 12 : index
    %60 = memref.load %arg1[%c12] : memref<32xi32, #tpu.memory_space<smem>>
    %61 = arith.index_cast %60 : i32 to index
    %c0_41 = arith.constant 0 : index
    %c0_42 = arith.constant 0 : index
    %62 = vector.load %arg2[%61, %c0_41, %c0_42] : memref<50x1x128xf32, #tpu.memory_space<vmem>>, vector<1x1x128xf32>
    %63 = vector.shape_cast %62 : vector<1x1x128xf32> to vector<1x128xf32>
    %c1_43 = arith.constant 1 : index
    %c512_44 = arith.constant 512 : index
    %64 = vector.load %arg8[%c1_43, %c512_44] : memref<4x1024xf32, #tpu.memory_space<vmem>>, vector<1x128xf32>
    tpu.vector_store %arg8[%c1_43, %c512_44], %63 {strides = array<i32>} : memref<4x1024xf32, #tpu.memory_space<vmem>>, vector<1x128xf32>,
    %c13 = arith.constant 13 : index
    %65 = memref.load %arg1[%c13] : memref<32xi32, #tpu.memory_space<smem>>
    %66 = arith.index_cast %65 : i32 to index
    %c0_45 = arith.constant 0 : index
    %c0_46 = arith.constant 0 : index
    %67 = vector.load %arg2[%66, %c0_45, %c0_46] : memref<50x1x128xf32, #tpu.memory_space<vmem>>, vector<1x1x128xf32>
    %68 = vector.shape_cast %67 : vector<1x1x128xf32> to vector<1x128xf32>
    %c1_47 = arith.constant 1 : index
    %c640_48 = arith.constant 640 : index
    %69 = vector.load %arg8[%c1_47, %c640_48] : memref<4x1024xf32, #tpu.memory_space<vmem>>, vector<1x128xf32>
    tpu.vector_store %arg8[%c1_47, %c640_48], %68 {strides = array<i32>} : memref<4x1024xf32, #tpu.memory_space<vmem>>, vector<1x128xf32>,
    %c14 = arith.constant 14 : index
    %70 = memref.load %arg1[%c14] : memref<32xi32, #tpu.memory_space<smem>>
    %71 = arith.index_cast %70 : i32 to index
    %c0_49 = arith.constant 0 : index
    %c0_50 = arith.constant 0 : index
    %72 = vector.load %arg2[%71, %c0_49, %c0_50] : memref<50x1x128xf32, #tpu.memory_space<vmem>>, vector<1x1x128xf32>
    %73 = vector.shape_cast %72 : vector<1x1x128xf32> to vector<1x128xf32>
    %c1_51 = arith.constant 1 : index
    %c768_52 = arith.constant 768 : index
    %74 = vector.load %arg8[%c1_51, %c768_52] : memref<4x1024xf32, #tpu.memory_space<vmem>>, vector<1x128xf32>
    tpu.vector_store %arg8[%c1_51, %c768_52], %73 {strides = array<i32>} : memref<4x1024xf32, #tpu.memory_space<vmem>>, vector<1x128xf32>,
    %c15 = arith.constant 15 : index
    %75 = memref.load %arg1[%c15] : memref<32xi32, #tpu.memory_space<smem>>
    %76 = arith.index_cast %75 : i32 to index
    %c0_53 = arith.constant 0 : index
    %c0_54 = arith.constant 0 : index
    %77 = vector.load %arg2[%76, %c0_53, %c0_54] : memref<50x1x128xf32, #tpu.memory_space<vmem>>, vector<1x1x128xf32>
    %78 = vector.shape_cast %77 : vector<1x1x128xf32> to vector<1x128xf32>
    %c1_55 = arith.constant 1 : index
    %c896_56 = arith.constant 896 : index
    %79 = vector.load %arg8[%c1_55, %c896_56] : memref<4x1024xf32, #tpu.memory_space<vmem>>, vector<1x128xf32>
    tpu.vector_store %arg8[%c1_55, %c896_56], %78 {strides = array<i32>} : memref<4x1024xf32, #tpu.memory_space<vmem>>, vector<1x128xf32>,
    %c16 = arith.constant 16 : index
    %80 = memref.load %arg1[%c16] : memref<32xi32, #tpu.memory_space<smem>>
    %81 = arith.index_cast %80 : i32 to index
    %c0_57 = arith.constant 0 : index
    %c0_58 = arith.constant 0 : index
    %82 = vector.load %arg2[%81, %c0_57, %c0_58] : memref<50x1x128xf32, #tpu.memory_space<vmem>>, vector<1x1x128xf32>
    %83 = vector.shape_cast %82 : vector<1x1x128xf32> to vector<1x128xf32>
    %c2_59 = arith.constant 2 : index
    %c0_60 = arith.constant 0 : index
    %84 = vector.load %arg8[%c2_59, %c0_60] : memref<4x1024xf32, #tpu.memory_space<vmem>>, vector<1x128xf32>
    tpu.vector_store %arg8[%c2_59, %c0_60], %83 {strides = array<i32>} : memref<4x1024xf32, #tpu.memory_space<vmem>>, vector<1x128xf32>,
    %c17 = arith.constant 17 : index
    %85 = memref.load %arg1[%c17] : memref<32xi32, #tpu.memory_space<smem>>
    %86 = arith.index_cast %85 : i32 to index
    %c0_61 = arith.constant 0 : index
    %c0_62 = arith.constant 0 : index
    %87 = vector.load %arg2[%86, %c0_61, %c0_62] : memref<50x1x128xf32, #tpu.memory_space<vmem>>, vector<1x1x128xf32>
    %88 = vector.shape_cast %87 : vector<1x1x128xf32> to vector<1x128xf32>
    %c2_63 = arith.constant 2 : index
    %c128_64 = arith.constant 128 : index
    %89 = vector.load %arg8[%c2_63, %c128_64] : memref<4x1024xf32, #tpu.memory_space<vmem>>, vector<1x128xf32>
    tpu.vector_store %arg8[%c2_63, %c128_64], %88 {strides = array<i32>} : memref<4x1024xf32, #tpu.memory_space<vmem>>, vector<1x128xf32>,
    %c18 = arith.constant 18 : index
    %90 = memref.load %arg1[%c18] : memref<32xi32, #tpu.memory_space<smem>>
    %91 = arith.index_cast %90 : i32 to index
    %c0_65 = arith.constant 0 : index
    %c0_66 = arith.constant 0 : index
    %92 = vector.load %arg2[%91, %c0_65, %c0_66] : memref<50x1x128xf32, #tpu.memory_space<vmem>>, vector<1x1x128xf32>
    %93 = vector.shape_cast %92 : vector<1x1x128xf32> to vector<1x128xf32>
    %c2_67 = arith.constant 2 : index
    %c256_68 = arith.constant 256 : index
    %94 = vector.load %arg8[%c2_67, %c256_68] : memref<4x1024xf32, #tpu.memory_space<vmem>>, vector<1x128xf32>
    tpu.vector_store %arg8[%c2_67, %c256_68], %93 {strides = array<i32>} : memref<4x1024xf32, #tpu.memory_space<vmem>>, vector<1x128xf32>,
    %c19 = arith.constant 19 : index
    %95 = memref.load %arg1[%c19] : memref<32xi32, #tpu.memory_space<smem>>
    %96 = arith.index_cast %95 : i32 to index
    %c0_69 = arith.constant 0 : index
    %c0_70 = arith.constant 0 : index
    %97 = vector.load %arg2[%96, %c0_69, %c0_70] : memref<50x1x128xf32, #tpu.memory_space<vmem>>, vector<1x1x128xf32>
    %98 = vector.shape_cast %97 : vector<1x1x128xf32> to vector<1x128xf32>
    %c2_71 = arith.constant 2 : index
    %c384_72 = arith.constant 384 : index
    %99 = vector.load %arg8[%c2_71, %c384_72] : memref<4x1024xf32, #tpu.memory_space<vmem>>, vector<1x128xf32>
    tpu.vector_store %arg8[%c2_71, %c384_72], %98 {strides = array<i32>} : memref<4x1024xf32, #tpu.memory_space<vmem>>, vector<1x128xf32>,
    %c20 = arith.constant 20 : index
    %100 = memref.load %arg1[%c20] : memref<32xi32, #tpu.memory_space<smem>>
    %101 = arith.index_cast %100 : i32 to index
    %c0_73 = arith.constant 0 : index
    %c0_74 = arith.constant 0 : index
    %102 = vector.load %arg2[%101, %c0_73, %c0_74] : memref<50x1x128xf32, #tpu.memory_space<vmem>>, vector<1x1x128xf32>
    %103 = vector.shape_cast %102 : vector<1x1x128xf32> to vector<1x128xf32>
    %c2_75 = arith.constant 2 : index
    %c512_76 = arith.constant 512 : index
    %104 = vector.load %arg8[%c2_75, %c512_76] : memref<4x1024xf32, #tpu.memory_space<vmem>>, vector<1x128xf32>
    tpu.vector_store %arg8[%c2_75, %c512_76], %103 {strides = array<i32>} : memref<4x1024xf32, #tpu.memory_space<vmem>>, vector<1x128xf32>,
    %c21 = arith.constant 21 : index
    %105 = memref.load %arg1[%c21] : memref<32xi32, #tpu.memory_space<smem>>
    %106 = arith.index_cast %105 : i32 to index
    %c0_77 = arith.constant 0 : index
    %c0_78 = arith.constant 0 : index
    %107 = vector.load %arg2[%106, %c0_77, %c0_78] : memref<50x1x128xf32, #tpu.memory_space<vmem>>, vector<1x1x128xf32>
    %108 = vector.shape_cast %107 : vector<1x1x128xf32> to vector<1x128xf32>
    %c2_79 = arith.constant 2 : index
    %c640_80 = arith.constant 640 : index
    %109 = vector.load %arg8[%c2_79, %c640_80] : memref<4x1024xf32, #tpu.memory_space<vmem>>, vector<1x128xf32>
    tpu.vector_store %arg8[%c2_79, %c640_80], %108 {strides = array<i32>} : memref<4x1024xf32, #tpu.memory_space<vmem>>, vector<1x128xf32>,
    %c22 = arith.constant 22 : index
    %110 = memref.load %arg1[%c22] : memref<32xi32, #tpu.memory_space<smem>>
    %111 = arith.index_cast %110 : i32 to index
    %c0_81 = arith.constant 0 : index
    %c0_82 = arith.constant 0 : index
    %112 = vector.load %arg2[%111, %c0_81, %c0_82] : memref<50x1x128xf32, #tpu.memory_space<vmem>>, vector<1x1x128xf32>
    %113 = vector.shape_cast %112 : vector<1x1x128xf32> to vector<1x128xf32>
    %c2_83 = arith.constant 2 : index
    %c768_84 = arith.constant 768 : index
    %114 = vector.load %arg8[%c2_83, %c768_84] : memref<4x1024xf32, #tpu.memory_space<vmem>>, vector<1x128xf32>
    tpu.vector_store %arg8[%c2_83, %c768_84], %113 {strides = array<i32>} : memref<4x1024xf32, #tpu.memory_space<vmem>>, vector<1x128xf32>,
    %c23 = arith.constant 23 : index
    %115 = memref.load %arg1[%c23] : memref<32xi32, #tpu.memory_space<smem>>
    %116 = arith.index_cast %115 : i32 to index
    %c0_85 = arith.constant 0 : index
    %c0_86 = arith.constant 0 : index
    %117 = vector.load %arg2[%116, %c0_85, %c0_86] : memref<50x1x128xf32, #tpu.memory_space<vmem>>, vector<1x1x128xf32>
    %118 = vector.shape_cast %117 : vector<1x1x128xf32> to vector<1x128xf32>
    %c2_87 = arith.constant 2 : index
    %c896_88 = arith.constant 896 : index
    %119 = vector.load %arg8[%c2_87, %c896_88] : memref<4x1024xf32, #tpu.memory_space<vmem>>, vector<1x128xf32>
    tpu.vector_store %arg8[%c2_87, %c896_88], %118 {strides = array<i32>} : memref<4x1024xf32, #tpu.memory_space<vmem>>, vector<1x128xf32>,
    %c24 = arith.constant 24 : index
    %120 = memref.load %arg1[%c24] : memref<32xi32, #tpu.memory_space<smem>>
    %121 = arith.index_cast %120 : i32 to index
    %c0_89 = arith.constant 0 : index
    %c0_90 = arith.constant 0 : index
    %122 = vector.load %arg2[%121, %c0_89, %c0_90] : memref<50x1x128xf32, #tpu.memory_space<vmem>>, vector<1x1x128xf32>
    %123 = vector.shape_cast %122 : vector<1x1x128xf32> to vector<1x128xf32>
    %c3_91 = arith.constant 3 : index
    %c0_92 = arith.constant 0 : index
    %124 = vector.load %arg8[%c3_91, %c0_92] : memref<4x1024xf32, #tpu.memory_space<vmem>>, vector<1x128xf32>
    tpu.vector_store %arg8[%c3_91, %c0_92], %123 {strides = array<i32>} : memref<4x1024xf32, #tpu.memory_space<vmem>>, vector<1x128xf32>,
    %c25 = arith.constant 25 : index
    %125 = memref.load %arg1[%c25] : memref<32xi32, #tpu.memory_space<smem>>
    %126 = arith.index_cast %125 : i32 to index
    %c0_93 = arith.constant 0 : index
    %c0_94 = arith.constant 0 : index
    %127 = vector.load %arg2[%126, %c0_93, %c0_94] : memref<50x1x128xf32, #tpu.memory_space<vmem>>, vector<1x1x128xf32>
    %128 = vector.shape_cast %127 : vector<1x1x128xf32> to vector<1x128xf32>
    %c3_95 = arith.constant 3 : index
    %c128_96 = arith.constant 128 : index
    %129 = vector.load %arg8[%c3_95, %c128_96] : memref<4x1024xf32, #tpu.memory_space<vmem>>, vector<1x128xf32>
    tpu.vector_store %arg8[%c3_95, %c128_96], %128 {strides = array<i32>} : memref<4x1024xf32, #tpu.memory_space<vmem>>, vector<1x128xf32>,
    %c26 = arith.constant 26 : index
    %130 = memref.load %arg1[%c26] : memref<32xi32, #tpu.memory_space<smem>>
    %131 = arith.index_cast %130 : i32 to index
    %c0_97 = arith.constant 0 : index
    %c0_98 = arith.constant 0 : index
    %132 = vector.load %arg2[%131, %c0_97, %c0_98] : memref<50x1x128xf32, #tpu.memory_space<vmem>>, vector<1x1x128xf32>
    %133 = vector.shape_cast %132 : vector<1x1x128xf32> to vector<1x128xf32>
    %c3_99 = arith.constant 3 : index
    %c256_100 = arith.constant 256 : index
    %134 = vector.load %arg8[%c3_99, %c256_100] : memref<4x1024xf32, #tpu.memory_space<vmem>>, vector<1x128xf32>
    tpu.vector_store %arg8[%c3_99, %c256_100], %133 {strides = array<i32>} : memref<4x1024xf32, #tpu.memory_space<vmem>>, vector<1x128xf32>,
    %c27 = arith.constant 27 : index
    %135 = memref.load %arg1[%c27] : memref<32xi32, #tpu.memory_space<smem>>
    %136 = arith.index_cast %135 : i32 to index
    %c0_101 = arith.constant 0 : index
    %c0_102 = arith.constant 0 : index
    %137 = vector.load %arg2[%136, %c0_101, %c0_102] : memref<50x1x128xf32, #tpu.memory_space<vmem>>, vector<1x1x128xf32>
    %138 = vector.shape_cast %137 : vector<1x1x128xf32> to vector<1x128xf32>
    %c3_103 = arith.constant 3 : index
    %c384_104 = arith.constant 384 : index
    %139 = vector.load %arg8[%c3_103, %c384_104] : memref<4x1024xf32, #tpu.memory_space<vmem>>, vector<1x128xf32>
    tpu.vector_store %arg8[%c3_103, %c384_104], %138 {strides = array<i32>} : memref<4x1024xf32, #tpu.memory_space<vmem>>, vector<1x128xf32>,
    %c28 = arith.constant 28 : index
    %140 = memref.load %arg1[%c28] : memref<32xi32, #tpu.memory_space<smem>>
    %141 = arith.index_cast %140 : i32 to index
    %c0_105 = arith.constant 0 : index
    %c0_106 = arith.constant 0 : index
    %142 = vector.load %arg2[%141, %c0_105, %c0_106] : memref<50x1x128xf32, #tpu.memory_space<vmem>>, vector<1x1x128xf32>
    %143 = vector.shape_cast %142 : vector<1x1x128xf32> to vector<1x128xf32>
    %c3_107 = arith.constant 3 : index
    %c512_108 = arith.constant 512 : index
    %144 = vector.load %arg8[%c3_107, %c512_108] : memref<4x1024xf32, #tpu.memory_space<vmem>>, vector<1x128xf32>
    tpu.vector_store %arg8[%c3_107, %c512_108], %143 {strides = array<i32>} : memref<4x1024xf32, #tpu.memory_space<vmem>>, vector<1x128xf32>,
    %c29 = arith.constant 29 : index
    %145 = memref.load %arg1[%c29] : memref<32xi32, #tpu.memory_space<smem>>
    %146 = arith.index_cast %145 : i32 to index
    %c0_109 = arith.constant 0 : index
    %c0_110 = arith.constant 0 : index
    %147 = vector.load %arg2[%146, %c0_109, %c0_110] : memref<50x1x128xf32, #tpu.memory_space<vmem>>, vector<1x1x128xf32>
    %148 = vector.shape_cast %147 : vector<1x1x128xf32> to vector<1x128xf32>
    %c3_111 = arith.constant 3 : index
    %c640_112 = arith.constant 640 : index
    %149 = vector.load %arg8[%c3_111, %c640_112] : memref<4x1024xf32, #tpu.memory_space<vmem>>, vector<1x128xf32>
    tpu.vector_store %arg8[%c3_111, %c640_112], %148 {strides = array<i32>} : memref<4x1024xf32, #tpu.memory_space<vmem>>, vector<1x128xf32>,
    %c30 = arith.constant 30 : index
    %150 = memref.load %arg1[%c30] : memref<32xi32, #tpu.memory_space<smem>>
    %151 = arith.index_cast %150 : i32 to index
    %c0_113 = arith.constant 0 : index
    %c0_114 = arith.constant 0 : index
    %152 = vector.load %arg2[%151, %c0_113, %c0_114] : memref<50x1x128xf32, #tpu.memory_space<vmem>>, vector<1x1x128xf32>
    %153 = vector.shape_cast %152 : vector<1x1x128xf32> to vector<1x128xf32>
    %c3_115 = arith.constant 3 : index
    %c768_116 = arith.constant 768 : index
    %154 = vector.load %arg8[%c3_115, %c768_116] : memref<4x1024xf32, #tpu.memory_space<vmem>>, vector<1x128xf32>
    tpu.vector_store %arg8[%c3_115, %c768_116], %153 {strides = array<i32>} : memref<4x1024xf32, #tpu.memory_space<vmem>>, vector<1x128xf32>,
    %c31 = arith.constant 31 : index
    %155 = memref.load %arg1[%c31] : memref<32xi32, #tpu.memory_space<smem>>
    %156 = arith.index_cast %155 : i32 to index
    %c0_117 = arith.constant 0 : index
    %c0_118 = arith.constant 0 : index
    %157 = vector.load %arg2[%156, %c0_117, %c0_118] : memref<50x1x128xf32, #tpu.memory_space<vmem>>, vector<1x1x128xf32>
    %158 = vector.shape_cast %157 : vector<1x1x128xf32> to vector<1x128xf32>
    %c3_119 = arith.constant 3 : index
    %c896_120 = arith.constant 896 : index
    %159 = vector.load %arg8[%c3_119, %c896_120] : memref<4x1024xf32, #tpu.memory_space<vmem>>, vector<1x128xf32>
    tpu.vector_store %arg8[%c3_119, %c896_120], %158 {strides = array<i32>} : memref<4x1024xf32, #tpu.memory_space<vmem>>, vector<1x128xf32>,
    %c0_121 = arith.constant 0 : index
    %c0_122 = arith.constant 0 : index
    %160 = vector.load %arg8[%c0_121, %c0_122] : memref<4x1024xf32, #tpu.memory_space<vmem>>, vector<4x1024xf32>
    %161 = arith.truncf %160 : vector<4x1024xf32> to vector<4x1024xbf16>
    %c0_123 = arith.constant 0 : index
    %c0_124 = arith.constant 0 : index
    %162 = vector.load %arg3[%c0_123, %c0_124] : memref<1024x256xbf16, #tpu.memory_space<vmem>>, vector<1024x256xbf16>
    %cst = arith.constant dense<0.000000e+00> : vector<4x256xf32>
    %163 = tpu.matmul %161, %162, %cst {dimension_numbers = #tpu.dot_dimension_numbers<[1], [0], [0], [1], [0, 0, 1, 1], [], []>} : vector<4x1024xbf16>, vector<1024x256xbf16>, vector<4x256xf32> -> vector<4x256xf32>
    %c0_125 = arith.constant 0 : index
    %c0_126 = arith.constant 0 : index
    %164 = vector.load %arg4[%c0_125, %c0_126] : memref<1x256xf32, #tpu.memory_space<vmem>>, vector<1x256xf32>
    %165 = vector.broadcast %164 : vector<1x256xf32> to vector<4x256xf32>
    %166 = arith.addf %163, %165 : vector<4x256xf32>
    %cst_127 = arith.constant 0.000000e+00 : f32
    %167 = vector.broadcast %cst_127 : f32 to vector<4x256xf32>
    %168 = arith.maximumf %166, %167 : vector<4x256xf32>
    %169 = vector.extract_strided_slice %168 {offsets = [0, 0], sizes = [4, 128], strides = [1, 1]} : vector<4x256xf32> to vector<4x128xf32>
    %170 = vector.extract_strided_slice %168 {offsets = [0, 128], sizes = [4, 128], strides = [1, 1]} : vector<4x256xf32> to vector<4x128xf32>
    %171 = arith.maximumf %169, %170 : vector<4x128xf32>
    %c64_i32 = arith.constant 64 : i32
    %172 = tpu.dynamic_rotate %171 by %c64_i32 dim 1 : vector<4x128xf32>, i32 -> vector<4x128xf32>
    %173 = arith.maximumf %171, %172 : vector<4x128xf32>
    %c32_i32 = arith.constant 32 : i32
    %174 = tpu.dynamic_rotate %173 by %c32_i32 dim 1 : vector<4x128xf32>, i32 -> vector<4x128xf32>
    %175 = arith.maximumf %173, %174 : vector<4x128xf32>
    %c0_128 = arith.constant 0 : index
    %c0_129 = arith.constant 0 : index
    %176 = vector.load %arg5[%c0_128, %c0_129] : memref<128x128xf32, #tpu.memory_space<vmem>>, vector<128x128xf32>
    %cst_130 = arith.constant dense<0.000000e+00> : vector<4x128xf32>
    %177 = tpu.matmul %175, %176, %cst_130 {dimension_numbers = #tpu.dot_dimension_numbers<[1], [0], [0], [1], [0, 0, 1, 1], [], []>} : vector<4x128xf32>, vector<128x128xf32>, vector<4x128xf32> -> vector<4x128xf32>
    %c0_131 = arith.constant 0 : index
    %c0_132 = arith.constant 0 : index
    %178 = vector.load %arg6[%c0_131, %c0_132] : memref<1x128xf32, #tpu.memory_space<vmem>>, vector<1x128xf32>
    %179 = vector.broadcast %178 : vector<1x128xf32> to vector<4x128xf32>
    %180 = arith.addf %177, %179 : vector<4x128xf32>
    %cst_133 = arith.constant dense<0xFF800000> : vector<4xf32>
    %181 = vector.multi_reduction <maximumf>, %180, %cst_133 [1] : vector<4x128xf32> to vector<4xf32>
    %182 = vector.shape_cast %181 : vector<4xf32> to vector<4x1xf32>
    %183 = vector.broadcast %182 : vector<4x1xf32> to vector<4x128xf32>
    %184 = arith.subf %180, %183 : vector<4x128xf32>
    %185 = math.exp %184 : vector<4x128xf32>
    %cst_134 = arith.constant dense<0.000000e+00> : vector<4xf32>
    %186 = vector.multi_reduction <add>, %185, %cst_134 [1] : vector<4x128xf32> to vector<4xf32>
    %187 = vector.shape_cast %186 : vector<4xf32> to vector<4x1xf32>
    %188 = tpu.reciprocal %187 {approx = true} : vector<4x1xf32> -> vector<4x1xf32>
    %189 = vector.broadcast %188 : vector<4x1xf32> to vector<4x128xf32>
    %190 = arith.mulf %185, %189 : vector<4x128xf32>
    %c0_135 = arith.constant 0 : index
    %c0_136 = arith.constant 0 : index
    %191 = vector.load %arg7[%c0_135, %c0_136] : memref<4x128xf32, #tpu.memory_space<vmem>>, vector<4x128xf32>
    tpu.vector_store %arg7[%c0_135, %c0_136], %190 {strides = array<i32>} : memref<4x128xf32, #tpu.memory_space<vmem>>, vector<4x128xf32>,
    return
  }
  func.func @transform_0(%arg0: i32, %arg1: memref<32xi32, #tpu.memory_space<smem>>) -> (i32, i32, i32) {
    %c0_i32 = arith.constant 0 : i32
    %c0_i32_0 = arith.constant 0 : i32
    %c0_i32_1 = arith.constant 0 : i32
    %c0_i32_2 = arith.constant 0 : i32
    return %c0_i32, %c0_i32_0, %c0_i32_1 : i32, i32, i32
  }
  func.func @transform_1(%arg0: i32, %arg1: memref<32xi32, #tpu.memory_space<smem>>) -> (i32, i32) {
    %c0_i32 = arith.constant 0 : i32
    %c0_i32_0 = arith.constant 0 : i32
    %c0_i32_1 = arith.constant 0 : i32
    return %c0_i32, %c0_i32_0 : i32, i32
  }
  func.func @transform_2(%arg0: i32, %arg1: memref<32xi32, #tpu.memory_space<smem>>) -> (i32, i32) {
    %c0_i32 = arith.constant 0 : i32
    %c0_i32_0 = arith.constant 0 : i32
    %c0_i32_1 = arith.constant 0 : i32
    return %c0_i32, %c0_i32_0 : i32, i32
  }
  func.func @transform_3(%arg0: i32, %arg1: memref<32xi32, #tpu.memory_space<smem>>) -> (i32, i32) {
    %c0_i32 = arith.constant 0 : i32
    %c0_i32_0 = arith.constant 0 : i32
    %c0_i32_1 = arith.constant 0 : i32
    return %c0_i32, %c0_i32_0 : i32, i32
  }
  func.func @transform_4(%arg0: i32, %arg1: memref<32xi32, #tpu.memory_space<smem>>) -> (i32, i32) {
    %c0_i32 = arith.constant 0 : i32
    %c0_i32_0 = arith.constant 0 : i32
    %c0_i32_1 = arith.constant 0 : i32
    return %c0_i32, %c0_i32_0 : i32, i32
  }
  func.func @transform_5(%arg0: i32, %arg1: memref<32xi32, #tpu.memory_space<smem>>) -> (i32, i32) {
    %c0_i32 = arith.constant 0 : i32
    %c0_i32_0 = arith.constant 0 : i32
    %c0_i32_1 = arith.constant 0 : i32
    return %c0_i32, %c0_i32_0 : i32, i32
  }
}

</mosaic_0001>

<bundles_post_ra>
// kernel: cnn_forward.1
= control target key start
LH: loop header
LB: loop body
LE: loop exit
PB: predicated region body
PF: predicated region fallthrough
CT: control target
= control target key end

     0   :  { %s2141_s24 = smov [#allocation4]   ;;  %s2327_s0 = inlined_call_operand.vmem [shape: s32[32], index: 0, kind: input, shape index: {}]   ;;  %s2328_s1 = inlined_call_operand.hbm [shape: f32[50,1,128], index: 1, kind: input, shape index: {}]   ;;  %s2329_s2 = inlined_call_operand.hbm [shape: bf16[1024,256], index: 2, kind: input, shape index: {}]   ;;  %s2330_s3 = inlined_call_operand.vmem [shape: f32[1,256], index: 3, kind: input, shape index: {}]   ;;  %s2331_s4 = inlined_call_operand.hbm [shape: f32[128,128], index: 4, kind: input, shape index: {}]   ;;  %s2332_s5 = inlined_call_operand.vmem [shape: f32[1,128], index: 5, kind: input, shape index: {}]   ;;  %s2333_s6 = inlined_call_operand.hbm [shape: f32[4,128], index: 6, kind: output, shape index: {}]  }
   0x1   :  { %s12_s23 = sshll.u32 %s2327_s0, 4  ;;  %s13_s23 = int_to_ptr.vmem [resolvable:$true] %s12_s23 }
   0x2   :  { %15 = dma.vmem_to_smem %s13_s23, 16, %s2141_s24, [#allocation3] }
   0x3   :  { %2133 = dma.done.wait [#allocation3], 16 }
   0x4   :  { %2134 = vsyncadd [#allocation3], 4294967280 }
   0x5   :  { %18 = sfence }
   0x6   :  { %19 = vsyncpa [#allocation6], 0 }
   0x7   :  { %20 = vsyncpa [#allocation9], 0  ;;  %s39_s27 = sshll.u32 %s2329_s2, 4  ;;  %s40_s27 = int_to_ptr.hbm [resolvable:$true] %s39_s27 }
   0x8   :  { %21 = vsyncpa [#allocation7], 0  ;;  %s2142_s28 = smov [#allocation8]   ;;  %s26_s0 = sshll.u32 %s2328_s1, 4  ;;  %s27_s0 = int_to_ptr.hbm [resolvable:$true] %s26_s0 }
   0x9   :  { %s41_s29 = sshll.u32 %s2142_s28, 4  ;;  %s2143_s8 = smov 128   ;;  %s42_s29 = int_to_ptr.vmem [resolvable:$true] %s41_s29 }
   0xa   :  { %s2144_s9 = smov 8   ;;  %s2145_s10 = smov [#allocation5]  }
   0xb   :  { %47 = dma.hbm_to_vmem [thread:$0]  %s40_s27, 16384, %s42_s29, [#allocation9], %s2143_s8, %s2143_s8, %s2144_s9  }
   0xc   :  { %s28_s11 = sshll.u32 %s2145_s10, 4  ;;  %s2146_s12 = smov 16   ;;  %s29_s11 = int_to_ptr.vmem [resolvable:$true] %s28_s11 }
   0xd   :  { %s2147_s13 = smov 1   ;;  %s54_s15 = sshll.u32 %s2331_s4, 4  ;;  %s55_s15 = int_to_ptr.hbm [resolvable:$true] %s54_s15 }
   0xe   :  { %34 = dma.hbm_to_vmem [thread:$0]  %s27_s0, 800, %s29_s11, [#allocation6], %s2146_s12, %s2146_s12, %s2147_s13  }
   0xf   :  { %s2148_s16 = smov [#allocation10]  }
  0x10   :  { %s56_s17 = sshll.u32 %s2148_s16, 4  ;;  %s57_s17 = int_to_ptr.vmem [resolvable:$true] %s56_s17 }
  0x11   :  { %62 = dma.hbm_to_vmem [thread:$0]  %s55_s15, 2048, %s57_s17, [#allocation9], %s2143_s8, %s2143_s8, %s2144_s9  }
  0x12   :  { %2135 = dma.done.wait [#allocation6], 800  }
  0x13   :  { %2136 = vsyncadd [#allocation6], 4294966496 }
  0x14   :  { %2137 = dma.done.wait [#allocation9], 18432  }
  0x15   :  { %2138 = vsyncadd [#allocation9], 4294948864  ;;  %v1427_v0 = vld [vmem:[#allocation8 + $0x70] sm:$0xf]  ;;  %v1896_v1 = vld [vmem:[#allocation8 + $0x74] sm:$0xf0] }
  0x16   :  { %v1491_v2 = vld [vmem:[#allocation8 + $0xf0] sm:$0xf]  ;;  %v1428_v3 = vor.u32 %v1896_v1, %v1427_v0  ;;  %v1912_v4 = vld [vmem:[#allocation8 + $0xf4] sm:$0xf0]  ;;  %v1419_v11 = vld [vmem:[#allocation8 + $0x60] sm:$0xf] }
  0x17   :  { %v1555_v5 = vld [vmem:[#allocation8 + $0x170] sm:$0xf]  ;;  %v1928_v6 = vld [vmem:[#allocation8 + $0x174] sm:$0xf0]  ;;  %v1492_v7 = vor.u32 %v1912_v4, %v1491_v2  ;;  %v1894_v13 = vld [vmem:[#allocation8 + $0x64] sm:$0xf0] }
  0x18   :  { %v1556_v8 = vor.u32 %v1928_v6, %v1555_v5  ;;  %v1619_v9 = vld [vmem:[#allocation8 + $0x1f0] sm:$0xf]  ;;  %v1944_v10 = vld [vmem:[#allocation8 + $0x1f4] sm:$0xf0]  ;;  %1018 = vmatpush.bf16.msra.mxu0 %v1428_v3  ;;  %v1483_v14 = vld [vmem:[#allocation8 + $0xe0] sm:$0xf]  ;;  %v1420_v16 = vor.u32 %v1894_v13, %v1419_v11 }
  0x19   :  { %v1620_v12 = vor.u32 %v1944_v10, %v1619_v9  ;;  %v1910_v15 = vld [vmem:[#allocation8 + $0xe4] sm:$0xf0]  ;;  %1031 = vmatpush.bf16.msra.mxu1 %v1492_v7  ;;  %v1547_v18 = vld [vmem:[#allocation8 + $0x160] sm:$0xf]  ;;  %v1411_v23 = vld [vmem:[#allocation8 + $0x50] sm:$0xf] }
  0x1a   :  { %1044 = vmatpush.bf16.msra.mxu2 %v1556_v8  ;;  %v1484_v17 = vor.u32 %v1910_v15, %v1483_v14  ;;  %v1926_v19 = vld [vmem:[#allocation8 + $0x164] sm:$0xf0]  ;;  %v1611_v20 = vld [vmem:[#allocation8 + $0x1e0] sm:$0xf]  ;;  %v1892_v24 = vld [vmem:[#allocation8 + $0x54] sm:$0xf0] }
  0x1b   :  { %1057 = vmatpush.bf16.msra.mxu3 %v1620_v12  ;;  %v1548_v21 = vor.u32 %v1926_v19, %v1547_v18  ;;  %v1942_v22 = vld [vmem:[#allocation8 + $0x1e4] sm:$0xf0]  ;;  %v1475_v26 = vld [vmem:[#allocation8 + $0xd0] sm:$0xf]  ;;  %v1908_v27 = vld [vmem:[#allocation8 + $0xd4] sm:$0xf0]  ;;  %v1412_v29 = vor.u32 %v1892_v24, %v1411_v23 }
  0x1c   :  { %v1612_v25 = vor.u32 %v1942_v22, %v1611_v20  ;;  %v1539_v28 = vld [vmem:[#allocation8 + $0x150] sm:$0xf]  ;;  %1019 = vmatpush.bf16.msra.mxu0 %v1420_v16  ;;  %v1924_v30 = vld [vmem:[#allocation8 + $0x154] sm:$0xf0]  ;;  %v1476_v33 = vor.u32 %v1908_v27, %v1475_v26  ;;  %v1403_v35 = vld [vmem:[#allocation8 + $0x40] sm:$0xf] }
  0x1d   :  { %v1603_v31 = vld [vmem:[#allocation8 + $0x1d0] sm:$0xf]  ;;  %v1940_v32 = vld [vmem:[#allocation8 + $0x1d4] sm:$0xf0]  ;;  %1032 = vmatpush.bf16.msra.mxu1 %v1484_v17  ;;  %v1540_v34 = vor.u32 %v1924_v30, %v1539_v28  ;;  %v1890_v36 = vld [vmem:[#allocation8 + $0x44] sm:$0xf0] }
  0x1e   :  { %1045 = vmatpush.bf16.msra.mxu2 %v1548_v21  ;;  %v1467_v37 = vld [vmem:[#allocation8 + $0xc0] sm:$0xf]  ;;  %v1604_v38 = vor.u32 %v1940_v32, %v1603_v31  ;;  %v1906_v39 = vld [vmem:[#allocation8 + $0xc4] sm:$0xf0]  ;;  %v1404_v44 = vor.u32 %v1890_v36, %v1403_v35  ;;  %v1395_v47 = vld [vmem:[#allocation8 + $0x30] sm:$0xf] }
  0x1f   :  { %1058 = vmatpush.bf16.msra.mxu3 %v1612_v25  ;;  %v1531_v40 = vld [vmem:[#allocation8 + $0x140] sm:$0xf]  ;;  %v1922_v41 = vld [vmem:[#allocation8 + $0x144] sm:$0xf0]  ;;  %v1468_v45 = vor.u32 %v1906_v39, %v1467_v37  ;;  %v1888_v48 = vld [vmem:[#allocation8 + $0x34] sm:$0xf0] }
  0x20   :  { %v1595_v42 = vld [vmem:[#allocation8 + $0x1c0] sm:$0xf]  ;;  %v1938_v43 = vld [vmem:[#allocation8 + $0x1c4] sm:$0xf0]  ;;  %1020 = vmatpush.bf16.msra.mxu0 %v1412_v29  ;;  %v1532_v46 = vor.u32 %v1922_v41, %v1531_v40  ;;  %v1459_v49 = vld [vmem:[#allocation8 + $0xb0] sm:$0xf]  ;;  %v1396_v56 = vor.u32 %v1888_v48, %v1395_v47 }
  0x21   :  { %1033 = vmatpush.bf16.msra.mxu1 %v1476_v33  ;;  %v1596_v50 = vor.u32 %v1938_v43, %v1595_v42  ;;  %v1904_v51 = vld [vmem:[#allocation8 + $0xb4] sm:$0xf0]  ;;  %v1523_v52 = vld [vmem:[#allocation8 + $0x130] sm:$0xf]  ;;  %v1387_v59 = vld [vmem:[#allocation8 + $0x20] sm:$0xf] }
  0x22   :  { %1046 = vmatpush.bf16.msra.mxu2 %v1540_v34  ;;  %v1920_v53 = vld [vmem:[#allocation8 + $0x134] sm:$0xf0]  ;;  %v1587_v54 = vld [vmem:[#allocation8 + $0x1b0] sm:$0xf]  ;;  %v1460_v57 = vor.u32 %v1904_v51, %v1459_v49  ;;  %v1886_v60 = vld [vmem:[#allocation8 + $0x24] sm:$0xf0] }
  0x23   :  { %1059 = vmatpush.bf16.msra.mxu3 %v1604_v38  ;;  %v1936_v55 = vld [vmem:[#allocation8 + $0x1b4] sm:$0xf0]  ;;  %v1524_v58 = vor.u32 %v1920_v53, %v1523_v52  ;;  %v1451_v61 = vld [vmem:[#allocation8 + $0xa0] sm:$0xf]  ;;  %v1902_v63 = vld [vmem:[#allocation8 + $0xa4] sm:$0xf0]  ;;  %v1388_v4 = vor.u32 %v1886_v60, %v1387_v59 }
  0x24   :  { %1021 = vmatpush.bf16.msra.mxu0 %v1404_v44  ;;  %v1588_v62 = vor.u32 %v1936_v55, %v1587_v54  ;;  %v1515_v0 = vld [vmem:[#allocation8 + $0x120] sm:$0xf]  ;;  %v1918_v1 = vld [vmem:[#allocation8 + $0x124] sm:$0xf0]  ;;  %s2199_s1 = sld [smem:[#allocation4 + $0x2]]  ;;  %v1452_v5 = vor.u32 %v1902_v63, %v1451_v61  ;;  %vm1275_vm0 = vcmask 1043456  }
  0x25   :  { %1034 = vmatpush.bf16.msra.mxu1 %v1468_v45  ;;  %v1579_v2 = vld [vmem:[#allocation8 + $0x1a0] sm:$0xf]  ;;  %v1934_v3 = vld [vmem:[#allocation8 + $0x1a4] sm:$0xf0]  ;;  %v1516_v6 = vor.u32 %v1918_v1, %v1515_v0  ;;  %v1379_v7 = vld [vmem:[#allocation8 + $0x10] sm:$0xf] }
  0x26   :  { %1047 = vmatpush.bf16.msra.mxu2 %v1532_v46  ;;  %v1884_v8 = vld [vmem:[#allocation8 + $0x14] sm:$0xf0]  ;;  %v1443_v9 = vld [vmem:[#allocation8 + $0x90] sm:$0xf]  ;;  %v1580_v10 = vor.u32 %v1934_v3, %v1579_v2  ;;  %s2201_s4 = sld [smem:[#allocation4 + $0x3]] }
  0x27   :  { %1060 = vmatpush.bf16.msra.mxu3 %v1596_v50  ;;  %v1900_v11 = vld [vmem:[#allocation8 + $0x94] sm:$0xf0]  ;;  %v1507_v12 = vld [vmem:[#allocation8 + $0x110] sm:$0xf]  ;;  %v1380_v16 = vor.u32 %v1884_v8, %v1379_v7  ;;  %v1371_v17 = vld [vmem:[#allocation8] sm:$0xf] }
  0x28   :  { %1022 = vmatpush.bf16.msra.mxu0 %v1396_v56  ;;  %v1916_v13 = vld [vmem:[#allocation8 + $0x114] sm:$0xf0]  ;;  %v1571_v14 = vld [vmem:[#allocation8 + $0x190] sm:$0xf]  ;;  %v1882_v18 = vld [vmem:[#allocation8 + $0x4] sm:$0xf0]  ;;  %v1444_v19 = vor.u32 %v1900_v11, %v1443_v9 }
  0x29   :  { %1035 = vmatpush.bf16.msra.mxu1 %v1460_v57  ;;  %v1932_v15 = vld [vmem:[#allocation8 + $0x194] sm:$0xf0]  ;;  %s2203_s18 = sld [smem:[#allocation4 + $0xa]]  ;;  %v1508_v20 = vor.u32 %v1916_v13, %v1507_v12  ;;  %v1435_v21 = vld [vmem:[#allocation8 + $0x80] sm:$0xf]  ;;  %v1372_v31 = vor.u32 %v1882_v18, %v1371_v17 }
  0x2a   :  { %1048 = vmatpush.bf16.msra.mxu2 %v1524_v58  ;;  %v1898_v22 = vld [vmem:[#allocation8 + $0x84] sm:$0xf0]  ;;  %v1499_v23 = vld [vmem:[#allocation8 + $0x100] sm:$0xf]  ;;  %v1572_v24 = vor.u32 %v1932_v15, %v1571_v14  ;;  %v1683_v28 = vld [vmem:[#allocation8 + $0x270] sm:$0xf] }
  0x2b   :  { %1061 = vmatpush.bf16.msra.mxu3 %v1588_v62  ;;  %v1914_v25 = vld [vmem:[#allocation8 + $0x104] sm:$0xf0]  ;;  %v1563_v26 = vld [vmem:[#allocation8 + $0x180] sm:$0xf]  ;;  %v1960_v29 = vld [vmem:[#allocation8 + $0x274] sm:$0xf0]  ;;  %v1436_v35 = vor.u32 %v1898_v22, %v1435_v21 }
  0x2c   :  { %1023 = vmatpush.bf16.msra.mxu0 %v1388_v4  ;;  %v1930_v27 = vld [vmem:[#allocation8 + $0x184] sm:$0xf0]  ;;  %v1747_v30 = vld [vmem:[#allocation8 + $0x2f0] sm:$0xf]  ;;  %v1976_v32 = vld [vmem:[#allocation8 + $0x2f4] sm:$0xf0]  ;;  %v1500_v36 = vor.u32 %v1914_v25, %v1499_v23  ;;  %v1684_v40 = vor.u32 %v1960_v29, %v1683_v28 }
  0x2d   :  { %1036 = vmatpush.bf16.msra.mxu1 %v1452_v5  ;;  %v1811_v33 = vld [vmem:[#allocation8 + $0x370] sm:$0xf]  ;;  %v1992_v34 = vld [vmem:[#allocation8 + $0x374] sm:$0xf0]  ;;  %s2205_s19 = sld [smem:[#allocation4 + $0xb]]  ;;  %v1564_v39 = vor.u32 %v1930_v27, %v1563_v26  ;;  %v1748_v41 = vor.u32 %v1976_v32, %v1747_v30  ;;  %s86_s22 = scalar_lea.vmem [#allocation5], %s2199_s1 }
  0x2e   :  { %1049 = vmatpush.bf16.msra.mxu2 %v1516_v6  ;;  %v1875_v37 = vld [vmem:[#allocation8 + $0x3f0] sm:$0xf]  ;;  %v2008_v38 = vld [vmem:[#allocation8 + $0x3f4] sm:$0xf0]  ;;  %s2207_s20 = sld [smem:[#allocation4 + $0x12]]  ;;  %v1812_v42 = vor.u32 %v1992_v34, %v1811_v33  ;;  %s90_s23 = scalar_lea.vmem [#allocation5], %s2201_s4 }
  0x2f   :  { %1062 = vmatpush.bf16.msra.mxu3 %v1580_v10  ;;  %v1675_v43 = vld [vmem:[#allocation8 + $0x260] sm:$0xf]  ;;  %v1958_v44 = vld [vmem:[#allocation8 + $0x264] sm:$0xf0]  ;;  %v1876_v46 = vor.u32 %v2008_v38, %v1875_v37  ;;  %s2209_s21 = sld [smem:[#allocation4 + $0x13]]  ;;  %s118_s24 = scalar_lea.vmem [#allocation5], %s2203_s18 }
  0x30   :  { %1024 = vmatpush.bf16.msra.mxu0 %v1380_v16  ;;  %v1739_v45 = vld [vmem:[#allocation8 + $0x2e0] sm:$0xf]  ;;  %v1974_v47 = vld [vmem:[#allocation8 + $0x2e4] sm:$0xf0]  ;;  %v1676_v52 = vor.u32 %v1958_v44, %v1675_v43  ;;  %v1667_v53 = vld [vmem:[#allocation8 + $0x250] sm:$0xf] }
  0x31   :  { %1037 = vmatpush.bf16.msra.mxu1 %v1444_v19  ;;  %v1803_v48 = vld [vmem:[#allocation8 + $0x360] sm:$0xf]  ;;  %v1990_v49 = vld [vmem:[#allocation8 + $0x364] sm:$0xf0]  ;;  %v1740_v54 = vor.u32 %v1974_v47, %v1739_v45  ;;  %v1956_v56 = vld [vmem:[#allocation8 + $0x254] sm:$0xf0] }
  0x32   :  { %1050 = vmatpush.bf16.msra.mxu2 %v1508_v20  ;;  %v1867_v50 = vld [vmem:[#allocation8 + $0x3e0] sm:$0xf]  ;;  %v2006_v51 = vld [vmem:[#allocation8 + $0x3e4] sm:$0xf0]  ;;  %v1804_v55 = vor.u32 %v1990_v49, %v1803_v48  ;;  %v1731_v57 = vld [vmem:[#allocation8 + $0x2d0] sm:$0xf]  ;;  %v1668_v2 = vor.u32 %v1956_v56, %v1667_v53 }
  0x33   :  { %1063 = vmatpush.bf16.msra.mxu3 %v1572_v24  ;;  %v1972_v58 = vld [vmem:[#allocation8 + $0x2d4] sm:$0xf0]  ;;  %v1868_v59 = vor.u32 %v2006_v51, %v1867_v50  ;;  %v1795_v60 = vld [vmem:[#allocation8 + $0x350] sm:$0xf]  ;;  %v1659_v0 = vld [vmem:[#allocation8 + $0x240] sm:$0xf] }
  0x34   :  { %1025 = vmatpush.bf16.msra.mxu0 %v1372_v31  ;;  %v1988_v61 = vld [vmem:[#allocation8 + $0x354] sm:$0xf0]  ;;  %v1859_v62 = vld [vmem:[#allocation8 + $0x3d0] sm:$0xf]  ;;  %v1954_v1 = vld [vmem:[#allocation8 + $0x244] sm:$0xf0]  ;;  %v1732_v7 = vor.u32 %v1972_v58, %v1731_v57 }
  0x35   :  { %1038 = vmatpush.bf16.msra.mxu1 %v1436_v35  ;;  %v2004_v63 = vld [vmem:[#allocation8 + $0x3d4] sm:$0xf0]  ;;  %v1723_v3 = vld [vmem:[#allocation8 + $0x2c0] sm:$0xf]  ;;  %v1970_v4 = vld [vmem:[#allocation8 + $0x2c4] sm:$0xf0]  ;;  %v1796_v8 = vor.u32 %v1988_v61, %v1795_v60  ;;  %v1660_v18 = vor.u32 %v1954_v1, %v1659_v0 }
  0x36   :  { %1051 = vmatpush.bf16.msra.mxu2 %v1500_v36  ;;  %v1787_v5 = vld [vmem:[#allocation8 + $0x340] sm:$0xf]  ;;  %v1986_v6 = vld [vmem:[#allocation8 + $0x344] sm:$0xf0]  ;;  %v87_v11 = vld [vmem:[%s86_s22] sm:$0x1]  ;;  %v1860_v13 = vor.u32 %v2004_v63, %v1859_v62  ;;  %v1724_v25 = vor.u32 %v1970_v4, %v1723_v3 }
  0x37   :  { %1064 = vmatpush.bf16.msra.mxu3 %v1564_v39  ;;  %v1851_v9 = vld [vmem:[#allocation8 + $0x3c0] sm:$0xf]  ;;  %v2002_v10 = vld [vmem:[#allocation8 + $0x3c4] sm:$0xf0]  ;;  %v91_v12 = vld [vmem:[%s90_s23] sm:$0x1]  ;;  %v1788_v26 = vor.u32 %v1986_v6, %v1787_v5 }
  0x38   :  { %1070 = vmatpush.bf16.msrb.mxu0 %v1684_v40  ;;  %88 = vst [vmem:[#allocation2 + $0x8] sm:$0x1] %v87_v11  ;;  %v119_v14 = vld [vmem:[%s118_s24] sm:$0x1]  ;;  %s122_s25 = scalar_lea.vmem [#allocation5], %s2205_s19  ;;  %s150_s26 = scalar_lea.vmem [#allocation5], %s2207_s20  ;;  %v1852_v28 = vor.u32 %v2002_v10, %v1851_v9 }
  0x39   :  { %1083 = vmatpush.bf16.msrb.mxu1 %v1748_v41  ;;  %v123_v15 = vld [vmem:[%s122_s25] sm:$0x1]  ;;  %v1651_v16 = vld [vmem:[#allocation8 + $0x230] sm:$0xf]  ;;  %v1952_v17 = vld [vmem:[#allocation8 + $0x234] sm:$0xf0] }
  0x3a   :  { %1096 = vmatpush.bf16.msrb.mxu2 %v1812_v42  ;;  %92 = vst [vmem:[#allocation2 + $0xc] sm:$0x1] %v91_v12  ;;  %v1715_v19 = vld [vmem:[#allocation8 + $0x2b0] sm:$0xf]  ;;  %v1968_v20 = vld [vmem:[#allocation8 + $0x2b4] sm:$0xf0]  ;;  %v1652_v31 = vor.u32 %v1952_v17, %v1651_v16 }
  0x3b   :  { %1109 = vmatpush.bf16.msrb.mxu3 %v1876_v46  ;;  %v1779_v21 = vld [vmem:[#allocation8 + $0x330] sm:$0xf]  ;;  %v1984_v22 = vld [vmem:[#allocation8 + $0x334] sm:$0xf0]  ;;  %120 = vst [vmem:[#allocation2 + $0x9] sm:$0x1] %v119_v14  ;;  %v1716_v34 = vor.u32 %v1968_v20, %v1715_v19 }
  0x3c   :  { %1071 = vmatpush.bf16.msrb.mxu0 %v1676_v52  ;;  %v151_v23 = vld [vmem:[%s150_s26] sm:$0x1]  ;;  %s154_s27 = scalar_lea.vmem [#allocation5], %s2209_s21  ;;  %v1843_v27 = vld [vmem:[#allocation8 + $0x3b0] sm:$0xf]  ;;  %s2217_s28 = sld [smem:[#allocation4 + $0x1a]]  ;;  %v1780_v35 = vor.u32 %v1984_v22, %v1779_v21 }
  0x3d   :  { %1084 = vmatpush.bf16.msrb.mxu1 %v1740_v54  ;;  %v155_v24 = vld [vmem:[%s154_s27] sm:$0x1]  ;;  %124 = vst [vmem:[#allocation2 + $0xd] sm:$0x1] %v123_v15  ;;  %v2000_v29 = vld [vmem:[#allocation8 + $0x3b4] sm:$0xf0] }
  0x3e   :  { %1097 = vmatpush.bf16.msrb.mxu2 %v1804_v55  ;;  %152 = vst [vmem:[#allocation2 + $0xa] sm:$0x1] %v151_v23  ;;  %s2219_s29 = sld [smem:[#allocation4 + $0x1b]]  ;;  %v1643_v30 = vld [vmem:[#allocation8 + $0x220] sm:$0xf]  ;;  %v1844_v38 = vor.u32 %v2000_v29, %v1843_v27 }
  0x3f   :  { %1110 = vmatpush.bf16.msrb.mxu3 %v1868_v59  ;;  %156 = vst [vmem:[#allocation2 + $0xe] sm:$0x1] %v155_v24  ;;  %s2221_s30 = sld [smem:[#allocation4]]  ;;  %v1950_v32 = vld [vmem:[#allocation8 + $0x224] sm:$0xf0] }
  0x40   :  { %1072 = vmatpush.bf16.msrb.mxu0 %v1668_v2  ;;  %v1707_v33 = vld [vmem:[#allocation8 + $0x2a0] sm:$0xf]  ;;  %s2223_s7 = sld [smem:[#allocation4 + $0x1]]  ;;  %v1966_v36 = vld [vmem:[#allocation8 + $0x2a4] sm:$0xf0]  ;;  %v1644_v42 = vor.u32 %v1950_v32, %v1643_v30 }
  0x41   :  { %1085 = vmatpush.bf16.msrb.mxu1 %v1732_v7  ;;  %v1771_v37 = vld [vmem:[#allocation8 + $0x320] sm:$0xf]  ;;  %s2225_s0 = sld [smem:[#allocation4 + $0x8]]  ;;  %v1982_v39 = vld [vmem:[#allocation8 + $0x324] sm:$0xf0]  ;;  %v1708_v44 = vor.u32 %v1966_v36, %v1707_v33 }
  0x42   :  { %1098 = vmatpush.bf16.msrb.mxu2 %v1796_v8  ;;  %v1835_v40 = vld [vmem:[#allocation8 + $0x3a0] sm:$0xf]  ;;  %s2227_s8 = sld [smem:[#allocation4 + $0x9]]  ;;  %v1998_v41 = vld [vmem:[#allocation8 + $0x3a4] sm:$0xf0]  ;;  %s182_s10 = scalar_lea.vmem [#allocation5], %s2217_s28  ;;  %v1772_v45 = vor.u32 %v1982_v39, %v1771_v37 }
  0x43   :  { %1111 = vmatpush.bf16.msrb.mxu3 %v1860_v13  ;;  %s2229_s9 = sld [smem:[#allocation4 + $0x10]]  ;;  %v183_v43 = vld [vmem:[%s182_s10] sm:$0x1]  ;;  %v1836_v47 = vor.u32 %v1998_v41, %v1835_v40  ;;  %v1635_v54 = vld [vmem:[#allocation8 + $0x210] sm:$0xf] }
  0x44   :  { %1073 = vmatpush.bf16.msrb.mxu0 %v1660_v18  ;;  %s2232_s11 = sld [smem:[#allocation4 + $0x11]]  ;;  %184 = vst [vmem:[#allocation2 + $0xb] sm:$0x1] %v183_v43  ;;  %s186_s12 = scalar_lea.vmem [#allocation5], %s2219_s29  ;;  %v1948_v56 = vld [vmem:[#allocation8 + $0x214] sm:$0xf0] }
  0x45   :  { %1086 = vmatpush.bf16.msrb.mxu1 %v1724_v25  ;;  %v187_v46 = vld [vmem:[%s186_s12] sm:$0x1]  ;;  %s78_s13 = scalar_lea.vmem [#allocation5], %s2221_s30  ;;  %s1361_s1 = sld [smem:[#allocation4 + $0x18]]  ;;  %v1699_v57 = vld [vmem:[#allocation8 + $0x290] sm:$0xf]  ;;  %v1636_v58 = vor.u32 %v1948_v56, %v1635_v54 }
  0x46   :  { %1099 = vmatpush.bf16.msrb.mxu2 %v1788_v26  ;;  %188 = vst [vmem:[#allocation2 + $0xf] sm:$0x1] %v187_v46  ;;  %v79_v48 = vld [vmem:[%s78_s13] sm:$0x1]  ;;  %s82_s2 = scalar_lea.vmem [#allocation5], %s2223_s7  ;;  %s2241_s4 = sld [smem:[#allocation4 + $0x19]] }
  0x47   :  { %1112 = vmatpush.bf16.msrb.mxu3 %v1852_v28  ;;  %80 = vst [vmem:[#allocation2] sm:$0x1] %v79_v48  ;;  %v83_v49 = vld [vmem:[%s82_s2] sm:$0x1]  ;;  %s110_s14 = scalar_lea.vmem [#allocation5], %s2225_s0  ;;  %s1343_s20 = sld [smem:[#allocation4 + $0x6]] }
  0x48   :  { %1074 = vmatpush.bf16.msrb.mxu0 %v1652_v31  ;;  %84 = vst [vmem:[#allocation2 + $0x4] sm:$0x1] %v83_v49  ;;  %v111_v50 = vld [vmem:[%s110_s14] sm:$0x1]  ;;  %s114_s15 = scalar_lea.vmem [#allocation5], %s2227_s8  ;;  %s2250_s21 = sld [smem:[#allocation4 + $0x7]] }
  0x49   :  { %1087 = vmatpush.bf16.msrb.mxu1 %v1716_v34  ;;  %112 = vst [vmem:[#allocation2 + $0x1] sm:$0x1] %v111_v50  ;;  %v115_v51 = vld [vmem:[%s114_s15] sm:$0x1]  ;;  %s142_s16 = scalar_lea.vmem [#allocation5], %s2229_s9  ;;  %s2252_s22 = sld [smem:[#allocation4 + $0xe]] }
  0x4a   :  { %1100 = vmatpush.bf16.msrb.mxu2 %v1780_v35  ;;  %116 = vst [vmem:[#allocation2 + $0x5] sm:$0x1] %v115_v51  ;;  %v143_v52 = vld [vmem:[%s142_s16] sm:$0x1]  ;;  %s146_s17 = scalar_lea.vmem [#allocation5], %s2232_s11  ;;  %s2254_s23 = sld [smem:[#allocation4 + $0xf]] }
  0x4b   :  { %1113 = vmatpush.bf16.msrb.mxu3 %v1844_v38  ;;  %144 = vst [vmem:[#allocation2 + $0x2] sm:$0x1] %v143_v52  ;;  %v147_v53 = vld [vmem:[%s146_s17] sm:$0x1]  ;;  %v1964_v59 = vld [vmem:[#allocation8 + $0x294] sm:$0xf0] }
  0x4c   :  { %1075 = vmatpush.bf16.msrb.mxu0 %v1644_v42  ;;  %148 = vst [vmem:[#allocation2 + $0x6] sm:$0x1] %v147_v53  ;;  %v1763_v60 = vld [vmem:[#allocation8 + $0x310] sm:$0xf]  ;;  %v1700_v61 = vor.u32 %v1964_v59, %v1699_v57  ;;  %v1980_v62 = vld [vmem:[#allocation8 + $0x314] sm:$0xf0] }
  0x4d   :  { %1088 = vmatpush.bf16.msrb.mxu1 %v1708_v44  ;;  %v206_v55 = vld [vmem:[#allocation2 + $0x8] sm:$0xff]  ;;  %v1827_v63 = vld [vmem:[#allocation8 + $0x390] sm:$0xf]  ;;  %v1764_v1 = vor.u32 %v1980_v62, %v1763_v60  ;;  %v1627_v3 = vld [vmem:[#allocation8 + $0x200] sm:$0xf]  ;;  %s174_s18 = scalar_lea.vmem [#allocation5], %s1361_s1 }
  0x4e   :  { %1101 = vmatpush.bf16.msrb.mxu2 %v1772_v45  ;;  %215 = vst [vmem:[#allocation1 + $0x10] ss:$2 sm:$0xff] %v206_v55  ;;  %v1996_v0 = vld [vmem:[#allocation8 + $0x394] sm:$0xf0]  ;;  %v1946_v4 = vld [vmem:[#allocation8 + $0x204] sm:$0xf0] }
  0x4f   :  { %1114 = vmatpush.bf16.msrb.mxu3 %v1836_v47  ;;  %v1828_v2 = vor.u32 %v1996_v0, %v1827_v63  ;;  %v1691_v5 = vld [vmem:[#allocation8 + $0x280] sm:$0xf]  ;;  %v1628_v6 = vor.u32 %v1946_v4, %v1627_v3  ;;  %v1962_v7 = vld [vmem:[#allocation8 + $0x284] sm:$0xf0]  ;;  %v175_v9 = vld [vmem:[%s174_s18] sm:$0x1] }
  0x50   :  { %1076 = vmatpush.bf16.msrb.mxu0 %v1636_v58  ;;  %v1755_v8 = vld [vmem:[#allocation8 + $0x300] sm:$0xf]  ;;  %v1692_v10 = vor.u32 %v1962_v7, %v1691_v5  ;;  %v1978_v11 = vld [vmem:[#allocation8 + $0x304] sm:$0xf0]  ;;  %176 = vst [vmem:[#allocation2 + $0x3] sm:$0x1] %v175_v9 }
  0x51   :  { %1089 = vmatpush.bf16.msrb.mxu1 %v1700_v61  ;;  %s178_s19 = scalar_lea.vmem [#allocation5], %s2241_s4  ;;  %v1756_v13 = vor.u32 %v1978_v11, %v1755_v8  ;;  %v1819_v14 = vld [vmem:[#allocation8 + $0x380] sm:$0xf]  ;;  %v1994_v15 = vld [vmem:[#allocation8 + $0x384] sm:$0xf0]  ;;  %s2256_s24 = sld [smem:[#allocation4 + $0x16]] }
  0x52   :  { %1102 = vmatpush.bf16.msrb.mxu2 %v1764_v1  ;;  %v179_v12 = vld [vmem:[%s178_s19] sm:$0x1]  ;;  %v1820_v18 = vor.u32 %v1994_v15, %v1819_v14  ;;  %v1927_v21 = vld [vmem:[#allocation8 + $0x174] sm:$0xf]  ;;  %v1557_v22 = vld [vmem:[#allocation8 + $0x178] sm:$0xf0] }
  0x53   :  { %1115 = vmatpush.bf16.msrb.mxu3 %v1828_v2  ;;  %180 = vst [vmem:[#allocation2 + $0x7] sm:$0x1] %v179_v12  ;;  %v1943_v23 = vld [vmem:[#allocation8 + $0x1f4] sm:$0xf]  ;;  %v1560_v24 = vor.u32 %v1927_v21, %v1557_v22  ;;  %v1621_v25 = vld [vmem:[#allocation8 + $0x1f8] sm:$0xf0] }
  0x54   :  { %1077 = vmatpush.bf16.msrb.mxu0 %v1628_v6  ;;  %v1624_v26 = vor.u32 %v1943_v23, %v1621_v25  ;;  %v1925_v27 = vld [vmem:[#allocation8 + $0x164] sm:$0xf]  ;;  %v1549_v28 = vld [vmem:[#allocation8 + $0x168] sm:$0xf0]  ;;  %v1895_v34 = vld [vmem:[#allocation8 + $0x74] sm:$0xf] }
  0x55   :  { %v222_v16 = vld.sshfl [vmem:[#allocation1 + $0x10] sm:$0xff pattern:$0x75316420]  ;;  %v223_v17 = vld.sshfl [vmem:[#allocation1 + $0x18] sm:$0xff pattern:$0x75316420]  ;;  %1090 = vmatpush.bf16.msrb.mxu1 %v1692_v10  ;;  %v1552_v32 = vor.u32 %v1925_v27, %v1549_v28 }
  0x56   :  { %v2244_v19 = vpack.c.bf16 %v222_v16, %v222_v16  ;;  %v2246_v20 = vpack.c.bf16 %v223_v17, %v223_v17  ;;  %1103 = vmatpush.bf16.msrb.mxu2 %v1756_v13  ;;  %v1941_v29 = vld [vmem:[#allocation8 + $0x1e4] sm:$0xf]  ;;  %v1613_v30 = vld [vmem:[#allocation8 + $0x1e8] sm:$0xf0]  ;;  %v1429_v35 = vld [vmem:[#allocation8 + $0x78] sm:$0xf0] }
  0x57   :  { %1116 = vmatpush.bf16.msrb.mxu3 %v1820_v18  ;;  %v1616_v33 = vor.u32 %v1941_v29, %v1613_v30  ;;  %v1923_v36 = vld [vmem:[#allocation8 + $0x154] sm:$0xf]  ;;  %v1541_v37 = vld [vmem:[#allocation8 + $0x158] sm:$0xf0]  ;;  %s2258_s25 = sld [smem:[#allocation4 + $0x17]]  ;;  %s102_s27 = scalar_lea.vmem [#allocation5], %s1343_s20  ;;  %v1432_v51 = vor.u32 %v1895_v34, %v1429_v35 }
  0x58   :  { %1052 = vmatmul.bf16.vlgmr.msra.gmra.mxu2 %v2244_v19  ;;  %1065 = vmatmul.bf16.vlgmr.msra.gmra.mxu3 %v2246_v20  ;;  %v1544_v38 = vor.u32 %v1923_v36, %v1541_v37  ;;  %v1939_v39 = vld [vmem:[#allocation8 + $0x1d4] sm:$0xf]  ;;  %v1605_v40 = vld [vmem:[#allocation8 + $0x1d8] sm:$0xf0]  ;;  %s2260_s26 = sld [smem:[#allocation4 + $0x1e]]  ;;  %s106_s29 = scalar_lea.vmem [#allocation5], %s2250_s21 }
  0x59   :  { %v1911_v41 = vld [vmem:[#allocation8 + $0xf4] sm:$0xf]  ;;  %v1493_v42 = vld [vmem:[#allocation8 + $0xf8] sm:$0xf0]  ;;  %v1608_v43 = vor.u32 %v1939_v39, %v1605_v40  ;;  %v1893_v44 = vld [vmem:[#allocation8 + $0x64] sm:$0xf] }
  0x5a   :  { %1148 = vmatpush.bf16.msra.mxu2 %v1560_v24  ;;  %v205_v31 = vld [vmem:[#allocation2] sm:$0xff]  ;;  %v1909_v46 = vld [vmem:[#allocation8 + $0xe4] sm:$0xf]  ;;  %s2262_s28 = sld [smem:[#allocation4 + $0x1f]]  ;;  %v1496_v52 = vor.u32 %v1911_v41, %v1493_v42  ;;  %s134_s30 = scalar_lea.vmem [#allocation5], %s2252_s22 }
  0x5b   :  { %1161 = vmatpush.bf16.msra.mxu3 %v1624_v26  ;;  %213 = vst [vmem:[#allocation1] ss:$2 sm:$0xff] %v205_v31  ;;  %v1421_v45 = vld [vmem:[#allocation8 + $0x68] sm:$0xf0]  ;;  %v103_v48 = vld [vmem:[%s102_s27] sm:$0x1] }
  0x5c   :  { %v1485_v47 = vld [vmem:[#allocation8 + $0xe8] sm:$0xf0]  ;;  %104 = vst [vmem:[#allocation2 + $0x18] sm:$0x1] %v103_v48  ;;  %v107_v55 = vld [vmem:[%s106_s29] sm:$0x1]  ;;  %v1424_v61 = vor.u32 %v1893_v44, %v1421_v45 }
  0x5d   :  { %108 = vst [vmem:[#allocation2 + $0x1c] sm:$0x1] %v107_v55  ;;  %v135_v56 = vld [vmem:[%s134_s30] sm:$0x1]  ;;  %s138_s7 = scalar_lea.vmem [#allocation5], %s2254_s23  ;;  %v1488_v62 = vor.u32 %v1909_v46, %v1485_v47  ;;  %s166_s0 = scalar_lea.vmem [#allocation5], %s2256_s24 }
  0x5e   :  { %1149 = vmatpush.bf16.msra.mxu2 %v1552_v32  ;;  %v139_v57 = vld [vmem:[%s138_s7] sm:$0x1]  ;;  %136 = vst [vmem:[#allocation2 + $0x19] sm:$0x1] %v135_v56  ;;  %v1891_v58 = vld [vmem:[#allocation8 + $0x54] sm:$0xf] }
  0x5f   :  { %1162 = vmatpush.bf16.msra.mxu3 %v1616_v33  ;;  %v1413_v59 = vld [vmem:[#allocation8 + $0x58] sm:$0xf0]  ;;  %v1907_v60 = vld [vmem:[#allocation8 + $0xd4] sm:$0xf]  ;;  %140 = vst [vmem:[#allocation2 + $0x1d] sm:$0x1] %v139_v57 }
  0x60   :  { %v167_v63 = vld [vmem:[%s166_s0] sm:$0x1]  ;;  %s170_s8 = scalar_lea.vmem [#allocation5], %s2258_s25  ;;  %v1477_v1 = vld [vmem:[#allocation8 + $0xd8] sm:$0xf0]  ;;  %s198_s9 = scalar_lea.vmem [#allocation5], %s2260_s26  ;;  %v1416_v4 = vor.u32 %v1891_v58, %v1413_v59 }
  0x61   :  { %v171_v0 = vld [vmem:[%s170_s8] sm:$0x1]  ;;  %168 = vst [vmem:[#allocation2 + $0x1a] sm:$0x1] %v167_v63  ;;  %s202_s10 = scalar_lea.vmem [#allocation5], %s2262_s28  ;;  %s2277_s11 = sld [smem:[#allocation4 + $0x4]]  ;;  %v1480_v5 = vor.u32 %v1907_v60, %v1477_v1 }
  0x62   :  { %1150 = vmatpush.bf16.msra.mxu2 %v1544_v38  ;;  %v220_v49 = vld.sshfl [vmem:[#allocation1] sm:$0xff pattern:$0x75316420]  ;;  %v221_v50 = vld.sshfl [vmem:[#allocation1 + $0x8] sm:$0xff pattern:$0x75316420] }
  0x63   :  { %1163 = vmatpush.bf16.msra.mxu3 %v1608_v43  ;;  %v2264_v53 = vpack.c.bf16 %v220_v49, %v220_v49  ;;  %v2266_v54 = vpack.c.bf16 %v221_v50, %v221_v50  ;;  %172 = vst [vmem:[#allocation2 + $0x1e] sm:$0x1] %v171_v0  ;;  %v199_v2 = vld [vmem:[%s198_s9] sm:$0x1]  ;;  %s2279_s12 = sld [smem:[#allocation4 + $0x5]]  ;;  %s2150_s26 = smov 32  }
  0x64   :  { %v203_v3 = vld [vmem:[%s202_s10] sm:$0x1]  ;;  %200 = vst [vmem:[#allocation2 + $0x1b] sm:$0x1] %v199_v2  ;;  %s2281_s13 = sld [smem:[#allocation4 + $0xc]]  ;;  %s2151_s29 = smov [#allocation11]  }
  0x65   :  { %1026 = vmatmul.bf16.vlgmr.msra.gmra.mxu0 %v2264_v53  ;;  %1039 = vmatmul.bf16.vlgmr.msra.gmra.mxu1 %v2266_v54  ;;  %204 = vst [vmem:[#allocation2 + $0x1f] sm:$0x1] %v203_v3  ;;  %v1889_v6 = vld [vmem:[#allocation8 + $0x44] sm:$0xf]  ;;  %v1405_v7 = vld [vmem:[#allocation8 + $0x48] sm:$0xf0] }
  0x66   :  { %1122 = vmatpush.bf16.msra.mxu0 %v1432_v51  ;;  %1135 = vmatpush.bf16.msra.mxu1 %v1496_v52  ;;  %v1905_v8 = vld [vmem:[#allocation8 + $0xc4] sm:$0xf]  ;;  %s2283_s2 = sld [smem:[#allocation4 + $0xd]]  ;;  %v1469_v9 = vld [vmem:[#allocation8 + $0xc8] sm:$0xf0]  ;;  %v1408_v13 = vor.u32 %v1889_v6, %v1405_v7  ;;  %s1293_s30 = sshll.u32 %s2151_s29, 4  ;;  %s1294_s30 = int_to_ptr.vmem [resolvable:$true] %s1293_s30 }
  0x67   :  { %v1921_v10 = vld [vmem:[#allocation8 + $0x144] sm:$0xf]  ;;  %s2285_s14 = sld [smem:[#allocation4 + $0x14]]  ;;  %v1533_v11 = vld [vmem:[#allocation8 + $0x148] sm:$0xf0]  ;;  %v1472_v14 = vor.u32 %v1905_v8, %v1469_v9  ;;  %s94_s17 = scalar_lea.vmem [#allocation5], %s2277_s11 }
  0x68   :  { %v1937_v12 = vld [vmem:[#allocation8 + $0x1c4] sm:$0xf]  ;;  %s2287_s15 = sld [smem:[#allocation4 + $0x15]]  ;;  %v1536_v15 = vor.u32 %v1921_v10, %v1533_v11  ;;  %v1597_v16 = vld [vmem:[#allocation8 + $0x1c8] sm:$0xf0] }
  0x69   :  { %v1887_v17 = vld [vmem:[#allocation8 + $0x34] sm:$0xf]  ;;  %s2289_s16 = sld [smem:[#allocation4 + $0x1c]]  ;;  %v1600_v18 = vor.u32 %v1937_v12, %v1597_v16  ;;  %v1397_v21 = vld [vmem:[#allocation8 + $0x38] sm:$0xf0]  ;;  %s98_s4 = scalar_lea.vmem [#allocation5], %s2279_s12 }
  0x6a   :  { %1123 = vmatpush.bf16.msra.mxu0 %v1424_v61  ;;  %1136 = vmatpush.bf16.msra.mxu1 %v1488_v62  ;;  %v95_v22 = vld [vmem:[%s94_s17] sm:$0x1]  ;;  %s1366_s1 = sld [smem:[#allocation4 + $0x1d]]  ;;  %s126_s18 = scalar_lea.vmem [#allocation5], %s2281_s13  ;;  %v1400_v26 = vor.u32 %v1887_v17, %v1397_v21  ;;  %v1903_v32 = vld [vmem:[#allocation8 + $0xb4] sm:$0xf] }
  0x6b   :  { %1151 = vmatpush.bf16.msra.mxu2 %v1536_v15  ;;  %96 = vst [vmem:[#allocation2 + $0x10] sm:$0x1] %v95_v22  ;;  %v99_v24 = vld [vmem:[%s98_s4] sm:$0x1]  ;;  %1164 = vmatpush.bf16.msra.mxu3 %v1600_v18  ;;  %v1461_v33 = vld [vmem:[#allocation8 + $0xb8] sm:$0xf0] }
  0x6c   :  { %v208_v23 = vld [vmem:[#allocation2 + $0x18] sm:$0xff]  ;;  %100 = vst [vmem:[#allocation2 + $0x14] sm:$0x1] %v99_v24  ;;  %s130_s19 = scalar_lea.vmem [#allocation5], %s2283_s2  ;;  %v1919_v34 = vld [vmem:[#allocation8 + $0x134] sm:$0xf]  ;;  %v1464_v36 = vor.u32 %v1903_v32, %v1461_v33 }
  0x6d   :  { %219 = vst [vmem:[#allocation1 + $0x30] ss:$2 sm:$0xff] %v208_v23  ;;  %v127_v25 = vld [vmem:[%s126_s18] sm:$0x1]  ;;  %s158_s20 = scalar_lea.vmem [#allocation5], %s2285_s14 }
  0x6e   :  { %1124 = vmatpush.bf16.msra.mxu0 %v1416_v4  ;;  %1137 = vmatpush.bf16.msra.mxu1 %v1480_v5  ;;  %v131_v27 = vld [vmem:[%s130_s19] sm:$0x1]  ;;  %128 = vst [vmem:[#allocation2 + $0x11] sm:$0x1] %v127_v25  ;;  %s162_s21 = scalar_lea.vmem [#allocation5], %s2287_s15 }
  0x6f   :  { %v159_v28 = vld [vmem:[%s158_s20] sm:$0x1]  ;;  %132 = vst [vmem:[#allocation2 + $0x15] sm:$0x1] %v131_v27  ;;  %s190_s22 = scalar_lea.vmem [#allocation5], %s2289_s16 }
  0x70   :  { %v163_v29 = vld [vmem:[%s162_s21] sm:$0x1]  ;;  %160 = vst [vmem:[#allocation2 + $0x12] sm:$0x1] %v159_v28  ;;  %s194_s23 = scalar_lea.vmem [#allocation5], %s1366_s1 }
  0x71   :  { %v191_v30 = vld [vmem:[%s190_s22] sm:$0x1]  ;;  %164 = vst [vmem:[#allocation2 + $0x16] sm:$0x1] %v163_v29  ;;  %v1525_v39 = vld [vmem:[#allocation8 + $0x138] sm:$0xf0] }
  0x72   :  { %1125 = vmatpush.bf16.msra.mxu0 %v1408_v13  ;;  %1138 = vmatpush.bf16.msra.mxu1 %v1472_v14  ;;  %v195_v31 = vld [vmem:[%s194_s23] sm:$0x1]  ;;  %192 = vst [vmem:[#allocation2 + $0x13] sm:$0x1] %v191_v30  ;;  %v1528_v41 = vor.u32 %v1919_v34, %v1525_v39  ;;  %v1935_v42 = vld [vmem:[#allocation8 + $0x1b4] sm:$0xf] }
  0x73   :  { %196 = vst [vmem:[#allocation2 + $0x17] sm:$0x1] %v195_v31  ;;  %v1589_v43 = vld [vmem:[#allocation8 + $0x1b8] sm:$0xf0]  ;;  %v1885_v44 = vld [vmem:[#allocation8 + $0x24] sm:$0xf] }
  0x74   :  { %v226_v35 = vld.sshfl [vmem:[#allocation1 + $0x30] sm:$0xff pattern:$0x75316420]  ;;  %v227_v38 = vld.sshfl [vmem:[#allocation1 + $0x38] sm:$0xff pattern:$0x75316420]  ;;  %v1592_v45 = vor.u32 %v1935_v42, %v1589_v43  ;;  %1152 = vmatpush.bf16.msra.mxu2 %v1528_v41 }
  0x75   :  { %v2298_v37 = vpack.c.bf16 %v226_v35, %v226_v35  ;;  %v2300_v40 = vpack.c.bf16 %v227_v38, %v227_v38  ;;  %v1389_v46 = vld [vmem:[#allocation8 + $0x28] sm:$0xf0]  ;;  %v1901_v47 = vld [vmem:[#allocation8 + $0xa4] sm:$0xf]  ;;  %v1883_v58 = vld [vmem:[#allocation8 + $0x14] sm:$0xf] }
  0x76   :  { %1126 = vmatpush.bf16.msra.mxu0 %v1400_v26  ;;  %1139 = vmatpush.bf16.msra.mxu1 %v1464_v36  ;;  %v1453_v48 = vld [vmem:[#allocation8 + $0xa8] sm:$0xf0]  ;;  %v1392_v49 = vor.u32 %v1885_v44, %v1389_v46  ;;  %v1917_v51 = vld [vmem:[#allocation8 + $0x124] sm:$0xf]  ;;  %v1381_v59 = vld [vmem:[#allocation8 + $0x18] sm:$0xf0] }
  0x77   :  { %1104 = vmatmul.bf16.vlgmr.msrb.gmra.mxu2 %v2298_v37  ;;  %1117 = vmatmul.bf16.vlgmr.msrb.gmra.mxu3 %v2300_v40  ;;  %v1456_v50 = vor.u32 %v1901_v47, %v1453_v48  ;;  %v1517_v52 = vld [vmem:[#allocation8 + $0x128] sm:$0xf0]  ;;  %v1933_v55 = vld [vmem:[#allocation8 + $0x1a4] sm:$0xf]  ;;  %v1384_v61 = vor.u32 %v1883_v58, %v1381_v59  ;;  %v1899_v62 = vld [vmem:[#allocation8 + $0x94] sm:$0xf] }
  0x78   :  { %1165 = vmatpush.bf16.msra.mxu3 %v1592_v45  ;;  %v1520_v56 = vor.u32 %v1917_v51, %v1517_v52  ;;  %v1581_v57 = vld [vmem:[#allocation8 + $0x1a8] sm:$0xf0]  ;;  %v1445_v63 = vld [vmem:[#allocation8 + $0x98] sm:$0xf0]  ;;  %v1915_v0 = vld [vmem:[#allocation8 + $0x114] sm:$0xf] }
  0x79   :  { %v1584_v60 = vor.u32 %v1933_v55, %v1581_v57  ;;  %v1448_v2 = vor.u32 %v1899_v62, %v1445_v63  ;;  %v1509_v3 = vld [vmem:[#allocation8 + $0x118] sm:$0xf0]  ;;  %v1931_v4 = vld [vmem:[#allocation8 + $0x194] sm:$0xf]  ;;  %v1881_v7 = vld [vmem:[#allocation8 + $0x4] sm:$0xf] }
  0x7a   :  { %1127 = vmatpush.bf16.msra.mxu0 %v1392_v49  ;;  %1140 = vmatpush.bf16.msra.mxu1 %v1456_v50  ;;  %v207_v1 = vld [vmem:[#allocation2 + $0x10] sm:$0xff]  ;;  %v1512_v5 = vor.u32 %v1915_v0, %v1509_v3  ;;  %v1373_v9 = vld [vmem:[#allocation8 + $0x8] sm:$0xf0]  ;;  %v1959_v18 = vld [vmem:[#allocation8 + $0x274] sm:$0xf] }
  0x7b   :  { %217 = vst [vmem:[#allocation1 + $0x20] ss:$2 sm:$0xff] %v207_v1  ;;  %1153 = vmatpush.bf16.msra.mxu2 %v1520_v56  ;;  %v1573_v6 = vld [vmem:[#allocation8 + $0x198] sm:$0xf0]  ;;  %v1897_v10 = vld [vmem:[#allocation8 + $0x84] sm:$0xf]  ;;  %v1376_v12 = vor.u32 %v1881_v7, %v1373_v9 }
  0x7c   :  { %1166 = vmatpush.bf16.msra.mxu3 %v1584_v60  ;;  %v1576_v8 = vor.u32 %v1931_v4, %v1573_v6  ;;  %v1437_v11 = vld [vmem:[#allocation8 + $0x88] sm:$0xf0]  ;;  %v1913_v14 = vld [vmem:[#allocation8 + $0x104] sm:$0xf]  ;;  %v1685_v21 = vld [vmem:[#allocation8 + $0x278] sm:$0xf0] }
  0x7d   :  { %v1440_v13 = vor.u32 %v1897_v10, %v1437_v11  ;;  %v1501_v15 = vld [vmem:[#allocation8 + $0x108] sm:$0xf0]  ;;  %v1929_v16 = vld [vmem:[#allocation8 + $0x184] sm:$0xf]  ;;  %v1975_v23 = vld [vmem:[#allocation8 + $0x2f4] sm:$0xf]  ;;  %v1688_v36 = vor.u32 %v1959_v18, %v1685_v21 }
  0x7e   :  { %1128 = vmatpush.bf16.msra.mxu0 %v1384_v61  ;;  %1141 = vmatpush.bf16.msra.mxu1 %v1448_v2  ;;  %v1565_v17 = vld [vmem:[#allocation8 + $0x188] sm:$0xf0]  ;;  %v1504_v22 = vor.u32 %v1913_v14, %v1501_v15  ;;  %v1749_v24 = vld [vmem:[#allocation8 + $0x2f8] sm:$0xf0]  ;;  %v1991_v25 = vld [vmem:[#allocation8 + $0x374] sm:$0xf] }
  0x7f   :  { %1154 = vmatpush.bf16.msra.mxu2 %v1512_v5  ;;  %v1568_v26 = vor.u32 %v1929_v16, %v1565_v17  ;;  %v1813_v27 = vld [vmem:[#allocation8 + $0x378] sm:$0xf0]  ;;  %v2007_v28 = vld [vmem:[#allocation8 + $0x3f4] sm:$0xf]  ;;  %v1957_v31 = vld [vmem:[#allocation8 + $0x264] sm:$0xf]  ;;  %v1752_v38 = vor.u32 %v1975_v23, %v1749_v24 }
  0x80   :  { %1167 = vmatpush.bf16.msra.mxu3 %v1576_v8  ;;  %v1877_v29 = vld [vmem:[#allocation8 + $0x3f8] sm:$0xf0]  ;;  %v1816_v30 = vor.u32 %v1991_v25, %v1813_v27  ;;  %v1677_v32 = vld [vmem:[#allocation8 + $0x268] sm:$0xf0]  ;;  %v1973_v33 = vld [vmem:[#allocation8 + $0x2e4] sm:$0xf] }
  0x81   :  { %v1880_v42 = vor.u32 %v2007_v28, %v1877_v29  ;;  %v1741_v43 = vld [vmem:[#allocation8 + $0x2e8] sm:$0xf0]  ;;  %v1989_v44 = vld [vmem:[#allocation8 + $0x364] sm:$0xf]  ;;  %v1680_v49 = vor.u32 %v1957_v31, %v1677_v32  ;;  %v1955_v51 = vld [vmem:[#allocation8 + $0x254] sm:$0xf] }
  0x82   :  { %1129 = vmatpush.bf16.msra.mxu0 %v1376_v12  ;;  %1142 = vmatpush.bf16.msra.mxu1 %v1440_v13  ;;  %v224_v34 = vld.sshfl [vmem:[#allocation1 + $0x20] sm:$0xff pattern:$0x75316420]  ;;  %v225_v35 = vld.sshfl [vmem:[#allocation1 + $0x28] sm:$0xff pattern:$0x75316420]  ;;  %v1744_v50 = vor.u32 %v1973_v33, %v1741_v43 }
  0x83   :  { %v2304_v39 = vpack.c.bf16 %v224_v34, %v224_v34  ;;  %v2306_v41 = vpack.c.bf16 %v225_v35, %v225_v35  ;;  %1155 = vmatpush.bf16.msra.mxu2 %v1504_v22  ;;  %v1805_v45 = vld [vmem:[#allocation8 + $0x368] sm:$0xf0]  ;;  %v2005_v47 = vld [vmem:[#allocation8 + $0x3e4] sm:$0xf]  ;;  %v1987_v52 = vld [vmem:[#allocation8 + $0x354] sm:$0xf] }
  0x84   :  { %1168 = vmatpush.bf16.msra.mxu3 %v1568_v26  ;;  %v1808_v46 = vor.u32 %v1989_v44, %v1805_v45  ;;  %v1869_v48 = vld [vmem:[#allocation8 + $0x3e8] sm:$0xf0]  ;;  %v1797_v55 = vld [vmem:[#allocation8 + $0x358] sm:$0xf0]  ;;  %v1971_v58 = vld [vmem:[#allocation8 + $0x2d4] sm:$0xf] }
  0x85   :  { %1078 = vmatmul.bf16.vlgmr.msrb.gmra.mxu0 %v2304_v39  ;;  %1091 = vmatmul.bf16.vlgmr.msrb.gmra.mxu1 %v2306_v41  ;;  %v1872_v56 = vor.u32 %v2005_v47, %v1869_v48  ;;  %v1669_v57 = vld [vmem:[#allocation8 + $0x258] sm:$0xf0]  ;;  %v1800_v60 = vor.u32 %v1987_v52, %v1797_v55  ;;  %v2003_v61 = vld [vmem:[#allocation8 + $0x3d4] sm:$0xf]  ;;  %v1985_v63 = vld [vmem:[#allocation8 + $0x344] sm:$0xf] }
  0x86   :  { %1174 = vmatpush.bf16.msrb.mxu0 %v1688_v36  ;;  %1187 = vmatpush.bf16.msrb.mxu1 %v1752_v38  ;;  %v1733_v59 = vld [vmem:[#allocation8 + $0x2d8] sm:$0xf0]  ;;  %v1789_v0 = vld [vmem:[#allocation8 + $0x348] sm:$0xf0]  ;;  %v1672_v1 = vor.u32 %v1955_v51, %v1669_v57  ;;  %v1953_v3 = vld [vmem:[#allocation8 + $0x244] sm:$0xf] }
  0x87   :  { %1200 = vmatpush.bf16.msrb.mxu2 %v1816_v30  ;;  %v1861_v62 = vld [vmem:[#allocation8 + $0x3d8] sm:$0xf0]  ;;  %1169 = vmatmul.bf16.vlgmr.msra.gmra.mxu3 %v2246_v20  ;;  %v1736_v2 = vor.u32 %v1971_v58, %v1733_v59  ;;  %v1661_v5 = vld [vmem:[#allocation8 + $0x248] sm:$0xf0]  ;;  %v1792_v7 = vor.u32 %v1985_v63, %v1789_v0  ;;  %v2001_v8 = vld [vmem:[#allocation8 + $0x3c4] sm:$0xf] }
  0x88   :  { %1213 = vmatpush.bf16.msrb.mxu3 %v1880_v42  ;;  %1156 = vmatmul.bf16.vlgmr.msra.gmra.mxu2 %v2244_v19  ;;  %v1864_v4 = vor.u32 %v2003_v61, %v1861_v62  ;;  %v1969_v19 = vld [vmem:[#allocation8 + $0x2c4] sm:$0xf]  ;;  %v1725_v6 = vld [vmem:[#allocation8 + $0x2c8] sm:$0xf0]  ;;  %v1983_v10 = vld [vmem:[#allocation8 + $0x334] sm:$0xf]  ;;  %v1664_v20 = vor.u32 %v1953_v3, %v1661_v5 }
  0x89   :  { %v1853_v9 = vld [vmem:[#allocation8 + $0x3c8] sm:$0xf0]  ;;  %v1781_v11 = vld [vmem:[#allocation8 + $0x338] sm:$0xf0]  ;;  %v1728_v12 = vor.u32 %v1969_v19, %v1725_v6  ;;  %v1951_v13 = vld [vmem:[#allocation8 + $0x234] sm:$0xf] }
  0x8a   :  { %1175 = vmatpush.bf16.msrb.mxu0 %v1680_v49  ;;  %1188 = vmatpush.bf16.msrb.mxu1 %v1744_v50  ;;  %v1856_v14 = vor.u32 %v2001_v8, %v1853_v9  ;;  %v1653_v15 = vld [vmem:[#allocation8 + $0x238] sm:$0xf0]  ;;  %v1967_v16 = vld [vmem:[#allocation8 + $0x2b4] sm:$0xf]  ;;  %v1784_v18 = vor.u32 %v1983_v10, %v1781_v11  ;;  %v1981_v23 = vld [vmem:[#allocation8 + $0x324] sm:$0xf] }
  0x8b   :  { %1201 = vmatpush.bf16.msrb.mxu2 %v1808_v46  ;;  %v1717_v17 = vld [vmem:[#allocation8 + $0x2b8] sm:$0xf0]  ;;  %v1999_v21 = vld [vmem:[#allocation8 + $0x3b4] sm:$0xf]  ;;  %v1773_v24 = vld [vmem:[#allocation8 + $0x328] sm:$0xf0]  ;;  %v1656_v25 = vor.u32 %v1951_v13, %v1653_v15 }
  0x8c   :  { %1214 = vmatpush.bf16.msrb.mxu3 %v1872_v56  ;;  %v1845_v22 = vld [vmem:[#allocation8 + $0x3b8] sm:$0xf0]  ;;  %v1720_v26 = vor.u32 %v1967_v16, %v1717_v17  ;;  %v1949_v27 = vld [vmem:[#allocation8 + $0x224] sm:$0xf]  ;;  %v1645_v29 = vld [vmem:[#allocation8 + $0x228] sm:$0xf0]  ;;  %v1776_v32 = vor.u32 %v1981_v23, %v1773_v24 }
  0x8d   :  { %v1848_v28 = vor.u32 %v1999_v21, %v1845_v22  ;;  %v1965_v30 = vld [vmem:[#allocation8 + $0x2a4] sm:$0xf]  ;;  %v1709_v31 = vld [vmem:[#allocation8 + $0x2a8] sm:$0xf0]  ;;  %v1979_v35 = vld [vmem:[#allocation8 + $0x314] sm:$0xf]  ;;  %v1648_v38 = vor.u32 %v1949_v27, %v1645_v29 }
  0x8e   :  { %1176 = vmatpush.bf16.msrb.mxu0 %v1672_v1  ;;  %1189 = vmatpush.bf16.msrb.mxu1 %v1736_v2  ;;  %v1997_v33 = vld [vmem:[#allocation8 + $0x3a4] sm:$0xf]  ;;  %v1837_v34 = vld [vmem:[#allocation8 + $0x3a8] sm:$0xf0]  ;;  %v1765_v36 = vld [vmem:[#allocation8 + $0x318] sm:$0xf0]  ;;  %v1712_v42 = vor.u32 %v1965_v30, %v1709_v31 }
  0x8f   :  { %1202 = vmatpush.bf16.msrb.mxu2 %v1800_v60  ;;  %v1947_v43 = vld [vmem:[#allocation8 + $0x214] sm:$0xf]  ;;  %v1840_v44 = vor.u32 %v1997_v33, %v1837_v34  ;;  %v1637_v45 = vld [vmem:[#allocation8 + $0x218] sm:$0xf0]  ;;  %v1768_v48 = vor.u32 %v1979_v35, %v1765_v36  ;;  %v1977_v51 = vld [vmem:[#allocation8 + $0x304] sm:$0xf] }
  0x90   :  { %1215 = vmatpush.bf16.msrb.mxu3 %v1864_v4  ;;  %v1963_v46 = vld [vmem:[#allocation8 + $0x294] sm:$0xf]  ;;  %v1701_v47 = vld [vmem:[#allocation8 + $0x298] sm:$0xf0]  ;;  %v1945_v55 = vld [vmem:[#allocation8 + $0x204] sm:$0xf] }
  0x91   :  { %v1995_v49 = vld [vmem:[#allocation8 + $0x394] sm:$0xf]  ;;  %v1829_v50 = vld [vmem:[#allocation8 + $0x398] sm:$0xf0]  ;;  %v1704_v52 = vor.u32 %v1963_v46, %v1701_v47  ;;  %v1629_v57 = vld [vmem:[#allocation8 + $0x208] sm:$0xf0] }
  0x92   :  { %1177 = vmatpush.bf16.msrb.mxu0 %v1664_v20  ;;  %1190 = vmatpush.bf16.msrb.mxu1 %v1728_v12  ;;  %v1832_v56 = vor.u32 %v1995_v49, %v1829_v50  ;;  %v1961_v58 = vld [vmem:[#allocation8 + $0x284] sm:$0xf]  ;;  %v1693_v59 = vld [vmem:[#allocation8 + $0x288] sm:$0xf0]  ;;  %v1632_v63 = vor.u32 %v1945_v55, %v1629_v57  ;;  %v1249_v57 = vld [vmem:[#allocation10 + $0x70] sm:$0xff] }
  0x93   :  { %1203 = vmatpush.bf16.msrb.mxu2 %v1792_v7  ;;  %v1993_v61 = vld [vmem:[#allocation8 + $0x384] sm:$0xf]  ;;  %v1821_v62 = vld [vmem:[#allocation8 + $0x388] sm:$0xf0]  ;;  %v1696_v0 = vor.u32 %v1961_v58, %v1693_v59 }
  0x94   :  { %1216 = vmatpush.bf16.msrb.mxu3 %v1856_v14  ;;  %v1824_v1 = vor.u32 %v1993_v61, %v1821_v62  ;;  %v372_v4 = vld [vmem:[%s2330_s3] sm:$0x3]  ;;  %s2149_s3 = smov 64   ;;  %v1248_v58 = vld [vmem:[#allocation10 + $0x68] sm:$0xff]  ;;  %v1245_v61 = vld [vmem:[#allocation10 + $0x50] sm:$0xff] }
  0x95   :  { %1130 = vmatmul.bf16.vlgmr.msra.gmra.mxu0 %v2264_v53  ;;  %1143 = vmatmul.bf16.vlgmr.msra.gmra.mxu1 %v2266_v54  ;;  %v1757_v53 = vld [vmem:[#allocation8 + $0x308] sm:$0xf0]  ;;  %v1640_v54 = vor.u32 %v1947_v43, %v1637_v45  ;;  %v374_v5 = vperm.slane %v372_v4, 0  ;;  %v375_v22 = vperm.slane %v372_v4, 1  ;;  %v1247_v59 = vld [vmem:[#allocation10 + $0x60] sm:$0xff]  ;;  %v1238_v4 = vld [vmem:[#allocation10 + $0x18] sm:$0xff] }
  0x96   :  { %1178 = vmatpush.bf16.msrb.mxu0 %v1656_v25  ;;  %1191 = vmatpush.bf16.msrb.mxu1 %v1720_v26  ;;  %v1760_v60 = vor.u32 %v1977_v51, %v1757_v53  ;;  %v1244_v62 = vld [vmem:[#allocation10 + $0x48] sm:$0xff] }
  0x97   :  { %1204 = vmatpush.bf16.msrb.mxu2 %v1784_v18 }
  0x98   :  { %1217 = vmatpush.bf16.msrb.mxu3 %v1848_v28 }
  0x9a   :  { %1179 = vmatpush.bf16.msrb.mxu0 %v1648_v38  ;;  %1192 = vmatpush.bf16.msrb.mxu1 %v1712_v42 }
  0x9b   :  { %1205 = vmatpush.bf16.msrb.mxu2 %v1776_v32 }
  0x9c   :  { %1218 = vmatpush.bf16.msrb.mxu3 %v1840_v44 }
  0x9e   :  { %1180 = vmatpush.bf16.msrb.mxu0 %v1640_v54  ;;  %1193 = vmatpush.bf16.msrb.mxu1 %v1704_v52 }
  0x9f   :  { %1206 = vmatpush.bf16.msrb.mxu2 %v1768_v48 }
  0xa0   :  { %1219 = vmatpush.bf16.msrb.mxu3 %v1832_v56  ;;  %v1250_v56 = vld [vmem:[#allocation10 + $0x78] sm:$0xff] }
  0xa2   :  { %1181 = vmatpush.bf16.msrb.mxu0 %v1632_v63  ;;  %1194 = vmatpush.bf16.msrb.mxu1 %v1696_v0  ;;  %v1243_v63 = vld [vmem:[#allocation10 + $0x40] sm:$0xff]  ;;  %v1242_v0 = vld [vmem:[#allocation10 + $0x38] sm:$0xff] }
  0xa3   :  { %1207 = vmatpush.bf16.msrb.mxu2 %v1760_v60  ;;  %v1246_v60 = vld [vmem:[#allocation10 + $0x58] sm:$0xff] }
  0xa4   :  { %1220 = vmatpush.bf16.msrb.mxu3 %v1824_v1  ;;  %v1241_v1 = vld [vmem:[#allocation10 + $0x30] sm:$0xff] }
  0xa5   :  { %1182 = vmatmul.bf16.vlgmr.msrb.gmra.mxu0 %v2304_v39  ;;  %1195 = vmatmul.bf16.vlgmr.msrb.gmra.mxu1 %v2306_v41 }
  0xa6   :  { %1208 = vmatmul.bf16.vlgmr.msrb.gmra.mxu2 %v2298_v37  ;;  %1255 = vmatpush.msra.mxu0 %v1250_v56 }
  0xa7   :  { %1221 = vmatmul.bf16.vlgmr.msrb.gmra.mxu3 %v2300_v40 }
  0xa8   :  { %1256 = vmatpush.msra.mxu0 %v1249_v57 }
  0xaa   :  { %1257 = vmatpush.msra.mxu0 %v1248_v58 }
  0xac   :  { %1258 = vmatpush.msra.mxu0 %v1247_v59 }
  0xae   :  { %1259 = vmatpush.msra.mxu0 %v1246_v60 }
  0xb0   :  { %1260 = vmatpush.msra.mxu0 %v1245_v61 }
  0xb2   :  { %1261 = vmatpush.msra.mxu0 %v1244_v62 }
  0xb4   :  { %1262 = vmatpush.msra.mxu0 %v1243_v63 }
  0xb6   :  { %1263 = vmatpush.msra.mxu0 %v1242_v0 }
  0xb8   :  { %1264 = vmatpush.msra.mxu0 %v1241_v1 }
  0xdb   :  { %v1053_v2 = vpop.f32.mrf.mxu2  ;;  %v1066_v3 = vpop.f32.mrf.mxu3 }
  0xe2   :  { %v1027_v19 = vpop.f32.mrf.mxu0  ;;  %v1040_v6 = vpop.f32.mrf.mxu1 }
  0xe3   :  { %v1028_v7 = vadd.f32 %v1027_v19, %v374_v5  ;;  %v1055_v8 = vpop.f32.mrf.mxu2  ;;  %v1068_v9 = vpop.f32.mrf.mxu3  ;;  %v1237_v5 = vld [vmem:[#allocation10 + $0x10] sm:$0xff]  ;;  %v1236_v19 = vld [vmem:[#allocation10 + $0x8] sm:$0xff] }
  0xe4   :  { %v1235_v8 = vld [vmem:[#allocation10] sm:$0xff] }
  0xe5   :  { %v1041_v10 = vadd.f32 %v1040_v6, %v1028_v7 }
  0xe7   :  { %v1054_v37 = vadd.f32 %v1053_v2, %v1041_v10  ;;  %v1240_v2 = vld [vmem:[#allocation10 + $0x28] sm:$0xff] }
  0xe8   :  { %1265 = vmatpush.msra.mxu0 %v1240_v2 }
  0xe9   :  { %v1067_v11 = vadd.f32 %v1066_v3, %v1054_v37  ;;  %v1239_v3 = vld [vmem:[#allocation10 + $0x20] sm:$0xff] }
  0xea   :  { %v1029_v39 = vpop.f32.mrf.mxu0  ;;  %v1042_v20 = vpop.f32.mrf.mxu1  ;;  %1266 = vmatpush.msra.mxu0 %v1239_v3  ;;  %v2020_v37 = vld [vmem:[%s2332_s5] ss:$0 sm:$0xff]  ;;  %s1295_s5 = sshll.u32 %s2333_s6, 4  ;;  %s1296_s5 = int_to_ptr.hbm [resolvable:$true] %s1295_s5 }
  0xec   :  { %1267 = vmatpush.msra.mxu0 %v1238_v4 }
  0xee   :  { %1268 = vmatpush.msra.mxu0 %v1237_v5 }
  0xf0   :  { %1269 = vmatpush.msra.mxu0 %v1236_v19 }
  0xf2   :  { %1270 = vmatpush.msra.mxu0 %v1235_v8 }
  0xfa   :  { %v1105_v41 = vpop.f32.mrf.mxu2  ;;  %v1118_v12 = vpop.f32.mrf.mxu3 }
 0x102   :  { %v1107_v40 = vpop.f32.mrf.mxu2  ;;  %v1079_v13 = vpop.f32.mrf.mxu0 }
 0x103   :  { %v1092_v14 = vpop.f32.mrf.mxu1  ;;  %v1120_v15 = vpop.f32.mrf.mxu3  ;;  %v1080_v31 = vadd.f32 %v1079_v13, %v1067_v11 }
 0x105   :  { %v1093_v33 = vadd.f32 %v1092_v14, %v1080_v31 }
 0x107   :  { %v1106_v42 = vadd.f32 %v1105_v41, %v1093_v33 }
 0x109   :  { %v1119_v46 = vadd.f32 %v1118_v12, %v1106_v42 }
 0x10a   :  { %v1081_v16 = vpop.f32.mrf.mxu0 }
 0x10b   :  { %v1094_v17 = vpop.f32.mrf.mxu1  ;;  %v1157_v18 = vpop.f32.mrf.mxu2  ;;  %v1226_v51 = vmax.f32 %v1119_v46, 0.0 }
 0x10c   :  { %v1170_v21 = vpop.f32.mrf.mxu3 }
 0x112   :  { %v1131_v23 = vpop.f32.mrf.mxu0 }
 0x113   :  { %v1144_v24 = vpop.f32.mrf.mxu1  ;;  %v1159_v25 = vpop.f32.mrf.mxu2  ;;  %v1132_v27 = vadd.f32 %v1131_v23, %v375_v22 }
 0x114   :  { %v1172_v26 = vpop.f32.mrf.mxu3 }
 0x115   :  { %v1145_v28 = vadd.f32 %v1144_v24, %v1132_v27 }
 0x117   :  { %v1158_v32 = vadd.f32 %v1157_v18, %v1145_v28 }
 0x119   :  { %v1171_v34 = vadd.f32 %v1170_v21, %v1158_v32 }
 0x11a   :  { %v1133_v29 = vpop.f32.mrf.mxu0 }
 0x11b   :  { %v1146_v30 = vpop.f32.mrf.mxu1 }
 0x122   :  { %v1183_v35 = vpop.f32.mrf.mxu0 }
 0x123   :  { %v1196_v36 = vpop.f32.mrf.mxu1  ;;  %v1184_v38 = vadd.f32 %v1183_v35, %v1171_v34 }
 0x125   :  { %v1197_v43 = vadd.f32 %v1196_v36, %v1184_v38 }
 0x129   :  { %v1209_v44 = vpop.f32.mrf.mxu2 }
 0x12a   :  { %v1210_v45 = vadd.f32 %v1209_v44, %v1197_v43  ;;  %v1222_v47 = vpop.f32.mrf.mxu3  ;;  %v1185_v49 = vpop.f32.mrf.mxu0 }
 0x12b   :  { %v1198_v50 = vpop.f32.mrf.mxu1 }
 0x12c   :  { %v1223_v48 = vadd.f32 %v1222_v47, %v1210_v45 }
 0x12e   :  { %v1227_v53 = vmax.f32 %v1223_v48, 0.0 }
 0x130   :  { %v1228_v52 = vmax.f32 %v1226_v51, %v1227_v53 }
 0x131   :  { %v1211_v54 = vpop.f32.mrf.mxu2 }
 0x132   :  { %1229 = vrot.lane.b32.xlu0 %v1228_v52, %s2149_s3  ;;  %v1224_v55 = vpop.f32.mrf.mxu3 }
 0x1a4   :  { %v1230_v6 = vpop.permute.xlu0 %1229 }
 0x1a5   :  { %v1231_v7 = vmax.f32 %v1228_v52, %v1230_v6 }
 0x1a7   :  { %1232 = vrot.lane.b32.xlu0 %v1231_v7, %s2150_s26 }
 0x219   :  { %v1233_v9 = vpop.permute.xlu0 %1232 }
 0x21a   :  { %v1234_v10 = vmax.f32 %v1231_v7, %v1233_v9 }
 0x21c   :  { %1271 = vmatmul.f32.vlgmr.msra.gmra.mxu0 %v1234_v10 }
 0x299   :  { %v1272_v11 = vpop.f32.mrf.mxu0 }
 0x29a   :  { %v1273_v39 = vadd.f32 %v2020_v37, %v1272_v11 }
 0x29c   :  { %v1276_v20 = vsel %vm1275_vm0, %v1273_v39, -inf }
 0x29d   :  { %1277 = vmax.xlane.f32.xlu1 %v1276_v20 }
 0x310   :  { %v1278_v41 = vpop.xlane.xlu1 %1277 }
 0x311   :  { %v1279_v12 = vsub.f32 %v1273_v39, %v1278_v41 }
 0x313   :  { %v1280_v40 = vmul.f32 1.442695, %v1279_v12 }
 0x315   :  { %2021 = vpow2.f32 %v1280_v40 }
 0x31b   :  { %v2022_v13 = vpop.eup %2021 }
 0x31c   :  { %v1282_v14 = vsel %vm1275_vm0, %v2022_v13, 0.0 }
 0x31d   :  { %1283 = vadd.xlane.f32.xlu1 %v1282_v14 }
 0x390   :  { %v1284_v15 = vpop.xlane.xlu1 %1283 }
 0x391   :  { %2023 = vrcp.f32 %v1284_v15 }
 0x397   :  { %v2024_v16 = vpop.eup %2023 }
 0x398   :  { %v1286_v17 = vmul.f32 %v2024_v16, %v2022_v13 }
 0x39a   :  { %1287 = vst [vmem:[#allocation11] sm:$0xf] %v1286_v17 }
 0x39b   :  { %1298 = dma.vmem_to_hbm [thread:$0]  %s1294_s30, 64, %s1296_s5, [#allocation7]  }
 0x39c   :  { %2139 = dma.done.wait [#allocation7], 64  }
 0x39d   :  { %2140 = vsyncadd [#allocation7], 4294967232 }
 0x39e   :  { %1303 = vsyncpa [#allocation6], 1 }
 0x39f   :  { %1304 = vsyncpa [#allocation9], 1 }
 0x3a0   :  { %1305 = vsyncpa [#allocation7], 1 }

</bundles_post_ra>
